<compile_context>
chip_gen: v6e
topology: v6e:2x2x1
jax: 0.10.0
libtpu: 0.0.40
codegen_flags: <defaults>
</compile_context>

<pallas_src>
import math

import jax
import jax.numpy as jnp
import numpy as np
from jax.experimental import pallas as pl
from jax.experimental.pallas import tpu as pltpu

PI = math.pi


def _layernorm(x, eps=1e-5):
    # nn.LayerNorm(..., elementwise_affine=False): biased variance, eps=1e-5.
    # var = E[x^2] - E[x]^2 keeps the two XLU reductions independent.
    mu = jnp.mean(x, axis=-1, keepdims=True)
    ms = jnp.mean(x * x, axis=-1, keepdims=True)
    var = ms - mu * mu
    return (x - mu) * jax.lax.rsqrt(var + eps)


def _convert_to_axis(x):
    return jnp.tanh(x) * PI


def _convert_to_arg(x):
    return jnp.tanh(2.0 * x) * (PI / 2.0) + PI / 2.0


def make_projection_kernel(block_b, d, H, R):
    """Fused Projection forward kernel (num_layers=2, att_mode='stack')."""
    D2 = 2 * d

    def kernel(src_ref, att_ref, rel_ref,
               rel_base_ref, rel_bias_ref,
               w1_ref, w2_ref, w0_ref, watt1_ref, watt2_ref,
               bias_ref,
               out_ref):
        src = src_ref[...]                                    # (Bb, 2d) = [axis | arg]
        lane = jax.lax.broadcasted_iota(jnp.int32, (block_b, D2), 1)
        is_axis = lane < d

        # Packed bias slab rows: 0=b1(H), 1=b2(H), 2=b0(2d), 3=batt1(d), 4=batt2(2d).
        b1 = bias_ref[0:1, :H]
        b2 = bias_ref[1:2, :H]
        b0 = bias_ref[2:3, :D2]
        batt1 = bias_ref[3:4, :d]
        batt2 = bias_ref[4:5, :D2]

        # ---------------- rtrans branch ----------------
        # att_ref is pre-scaled by arg_scale/emb_range in the wrapper.
        att = jnp.tanh(att_ref[...]) * PI                     # (Bb, R)
        # out[b,o] = sum_r att[b,r] * (src[b] @ rel_base[r])[o]
        # One wide MXU matmul, then R free 128-lane-aligned slices.
        t = jnp.dot(src, rel_base_ref[...],
                    preferred_element_type=jnp.float32)       # (Bb, R*2d)
        acc = jnp.zeros((block_b, D2), jnp.float32)
        for r in range(R):                                    # R small & static
            acc = acc + att[:, r:r + 1] * t[:, r * D2:(r + 1) * D2]
        bias = jnp.dot(att, rel_bias_ref[...], preferred_element_type=jnp.float32)
        x_rt = _layernorm(acc + bias)                         # (Bb, 2d)

        # ---------------- mlp branch ----------------
        # rel_ref is pre-scaled per-half (axis_scale / arg_scale over emb_range).
        rel = rel_ref[...]                                    # (Bb, 2d)
        r_conv = jnp.where(is_axis, _convert_to_axis(rel), _convert_to_arg(rel))
        h = src + r_conv
        h = jnp.maximum(
            jnp.dot(h, w1_ref[...], preferred_element_type=jnp.float32) + b1, 0.0)
        h = jnp.maximum(
            jnp.dot(h, w2_ref[...], preferred_element_type=jnp.float32) + b2, 0.0)
        x_mlp = _layernorm(
            jnp.dot(h, w0_ref[...], preferred_element_type=jnp.float32) + b0)

        # ---------------- attention merge (att_mode='stack') ----------------
        # Both branches stacked along sublanes -> one pass through the att MLP.
        xs = jnp.concatenate([x_rt, x_mlp], axis=0)           # (2Bb, 2d)
        a = jnp.maximum(
            jnp.dot(xs, watt1_ref[...], preferred_element_type=jnp.float32) + batt1, 0.0)
        logits = jnp.dot(a, watt2_ref[...], preferred_element_type=jnp.float32) + batt2
        l_rt = logits[:block_b, :]
        l_ml = logits[block_b:, :]
        m = jnp.maximum(l_rt, l_ml)
        e_rt = jnp.exp(l_rt - m)
        e_ml = jnp.exp(l_ml - m)
        inv = pl.reciprocal(e_rt + e_ml, approx=True)
        merged = (e_rt * inv) * x_rt + (e_ml * inv) * x_mlp   # (Bb, 2d)

        # Single lane-dense output; axis/arg conversion selected by lane mask.
        out_ref[...] = jnp.where(is_axis,
                                 _convert_to_axis(merged),
                                 _convert_to_arg(merged))

    return kernel


def projection_forward(params, src_axis, src_arg, rel_indices,
                       emb_range, axis_scale, arg_scale):
    B, d = src_axis.shape
    D2 = 2 * d
    R = params['rel_base'].shape[0]
    H = params['w1'].shape[1]

    # ---- wrapper-side glue (gathers, pre-scales, layout plumbing) ----
    att_g = params['rel_att'][rel_indices] * (arg_scale / emb_range)          # (B, R)
    rel_cat = jnp.concatenate(
        [params['rel_axis_embedding'][rel_indices] * (axis_scale / emb_range),
         params['rel_arg_embedding'][rel_indices] * (arg_scale / emb_range)],
        axis=-1)                                                              # (B, 2d)
    src_cat = jnp.concatenate([src_axis, src_arg], axis=-1)                   # (B, 2d)

    # rel_base (R, 2d, 2d) -> (2d, R*2d): W_big[i, r*2d + o] = rel_base[r, i, o]
    rel_base_big = jnp.transpose(params['rel_base'], (1, 0, 2)).reshape(D2, R * D2)

    # Pack the five bias rows into one slab (one DMA instead of five).
    Wpad = max(H, D2, d)

    def _row(b):
        return jnp.pad(b, ((0, 0), (0, Wpad - b.shape[1])))

    bias_slab = jnp.concatenate(
        [_row(params['b1']), _row(params['b2']), _row(params['b0']),
         _row(params['batt1']), _row(params['batt2'])], axis=0)               # (5, Wpad)

    # ---- pallas_call ----
    block_b = B if B <= 512 else 512
    assert B % block_b == 0, "TODO(synk): pad/mask ragged batch tails"
    grid = (B // block_b,)

    act_spec = lambda shape: pl.BlockSpec(shape, lambda i: (i, 0))
    const_spec = lambda shape: pl.BlockSpec(shape, lambda i: (0, 0))

    kernel = make_projection_kernel(block_b, d, H, R)
    out = pl.pallas_call(
        kernel,
        out_shape=jax.ShapeDtypeStruct((B, D2), jnp.float32),
        grid=grid,
        in_specs=[
            act_spec((block_b, D2)),        # src_cat
            act_spec((block_b, R)),         # att_g
            act_spec((block_b, D2)),        # rel_cat
            const_spec((D2, R * D2)),       # rel_base_big
            const_spec((R, D2)),            # rel_bias
            const_spec((D2, H)),            # w1
            const_spec((H, H)),             # w2
            const_spec((H, D2)),            # w0
            const_spec((D2, d)),            # watt1
            const_spec((d, D2)),            # watt2
            const_spec((5, Wpad)),          # bias slab
        ],
        out_specs=pl.BlockSpec((block_b, D2), lambda i: (i, 0)),
        compiler_params=pltpu.CompilerParams(
            dimension_semantics=("parallel",)),
    )(src_cat, att_g, rel_cat, rel_base_big, params['rel_bias'],
      params['w1'], params['w2'], params['w0'],
      params['watt1'], params['watt2'], bias_slab)

    return out[:, :d], out[:, d:]


def projection_reference(params, src_axis, src_arg, rel_indices,
                         emb_range, axis_scale, arg_scale):
    """Pure-JAX mirror of the PyTorch forward (proj_net='rtrans_mlp', att_mode='stack')."""
    d = src_axis.shape[1]

    def layernorm(x, eps=1e-5):
        mu = jnp.mean(x, axis=-1, keepdims=True)
        var = jnp.mean((x - mu) ** 2, axis=-1, keepdims=True)
        return (x - mu) * jax.lax.rsqrt(var + eps)

    # rtrans
    rel_att = _convert_to_axis(params['rel_att'][rel_indices] / emb_range * arg_scale)
    e = jnp.concatenate([src_axis, src_arg], axis=-1)
    project_r = jnp.einsum('br,rio->bio', rel_att, params['rel_base'])
    bias = jnp.einsum('br,ri->bi', rel_att, params['rel_bias'])
    x_rt = layernorm(jnp.einsum('bio,bi->bo', project_r, e) + bias)

    # mlp
    r_axis = _convert_to_axis(params['rel_axis_embedding'][rel_indices] / emb_range * axis_scale)
    r_arg = _convert_to_arg(params['rel_arg_embedding'][rel_indices] / emb_range * arg_scale)
    h = jnp.concatenate([src_axis + r_axis, src_arg + r_arg], axis=-1)
    h = jax.nn.relu(h @ params['w1'] + params['b1'])
    h = jax.nn.relu(h @ params['w2'] + params['b2'])
    x_mlp = layernorm(h @ params['w0'] + params['b0'])

    # attention merge ('stack')
    x_att = jnp.stack([x_rt, x_mlp])                                 # (2, B, 2d)
    a1 = jax.nn.relu(x_att @ params['watt1'] + params['batt1'])
    attention = jax.nn.softmax(a1 @ params['watt2'] + params['batt2'], axis=0)
    merged = jnp.sum(attention * x_att, axis=0)
    return _convert_to_axis(merged[:, :d]), _convert_to_arg(merged[:, d:])


if __name__ == "__main__":
    # Small, MXU/lane-friendly shapes: dim=64 -> relation_dim*2 = 128 lanes.
    B, dim, hidden, nrel, nbase = 8, 64, 128, 16, 8
    D2 = 2 * dim
    emb_range, axis_scale, arg_scale = 0.5, 1.0, 1.0

    key = jax.random.PRNGKey(0)
    ks = jax.random.split(key, 18)
    # TODO(synk): rel_base uses scaled-normal init instead of torch orthogonal_ (synthetic weights).
    params = dict(
        rel_base=0.1 * jax.random.normal(ks[0], (nbase, D2, D2), jnp.float32),
        rel_att=0.1 * jax.random.normal(ks[1], (nrel, nbase), jnp.float32),
        rel_bias=0.1 * jax.random.normal(ks[2], (nbase, D2), jnp.float32),
        rel_axis_embedding=jax.random.uniform(ks[3], (nrel, dim), jnp.float32,
                                              -emb_range, emb_range),
        rel_arg_embedding=jax.random.uniform(ks[4], (nrel, dim), jnp.float32,
                                             -emb_range, emb_range),
        # nn.Linear weights pre-transposed to (in, out); biases kept 2-D (1, out).
        w1=0.1 * jax.random.normal(ks[5], (D2, hidden), jnp.float32),
        b1=0.1 * jax.random.normal(ks[6], (1, hidden), jnp.float32),
        w2=0.1 * jax.random.normal(ks[7], (hidden, hidden), jnp.float32),
        b2=0.1 * jax.random.normal(ks[8], (1, hidden), jnp.float32),
        w0=0.1 * jax.random.normal(ks[9], (hidden, D2), jnp.float32),
        b0=0.1 * jax.random.normal(ks[10], (1, D2), jnp.float32),
        watt1=0.1 * jax.random.normal(ks[11], (D2, dim), jnp.float32),
        batt1=0.1 * jax.random.normal(ks[12], (1, dim), jnp.float32),
        watt2=0.1 * jax.random.normal(ks[13], (dim, D2), jnp.float32),
        batt2=0.1 * jax.random.normal(ks[14], (1, D2), jnp.float32),
    )
    src_axis = jax.random.normal(ks[15], (B, dim), jnp.float32)
    src_arg = jax.random.normal(ks[16], (B, dim), jnp.float32)
    rel_indices = jax.random.randint(ks[17], (B,), 0, nrel)

    axis_out, arg_out = projection_forward(
        params, src_axis, src_arg, rel_indices, emb_range, axis_scale, arg_scale)
    jax.block_until_ready((axis_out, arg_out))

    ref_axis, ref_arg = projection_reference(
        params, src_axis, src_arg, rel_indices, emb_range, axis_scale, arg_scale)
    # Slightly relaxed vs. exact f32: pl.reciprocal(approx=True) in the 2-way softmax.
    np.testing.assert_allclose(np.asarray(axis_out), np.asarray(ref_axis), rtol=2e-3, atol=2e-3)
    np.testing.assert_allclose(np.asarray(arg_out), np.asarray(ref_arg), rtol=2e-3, atol=2e-3)

    print("KERNEL_OK")
</pallas_src>

<mosaic_0001>
module attributes {stable_mosaic.version = 11 : i64} {
  func.func @kernel(%arg0: i32, %arg1: memref<8x128xf32, #tpu.memory_space<vmem>>, %arg2: memref<8x8xf32, #tpu.memory_space<vmem>>, %arg3: memref<8x128xf32, #tpu.memory_space<vmem>>, %arg4: memref<128x1024xf32, #tpu.memory_space<vmem>>, %arg5: memref<8x128xf32, #tpu.memory_space<vmem>>, %arg6: memref<128x128xf32, #tpu.memory_space<vmem>>, %arg7: memref<128x128xf32, #tpu.memory_space<vmem>>, %arg8: memref<128x128xf32, #tpu.memory_space<vmem>>, %arg9: memref<128x64xf32, #tpu.memory_space<vmem>>, %arg10: memref<64x128xf32, #tpu.memory_space<vmem>>, %arg11: memref<5x128xf32, #tpu.memory_space<vmem>>, %arg12: memref<8x128xf32, #tpu.memory_space<vmem>>) attributes {dimension_semantics = [#tpu.dimension_semantics<parallel>], iteration_bounds = array<i64: 1>, scalar_prefetch = 0 : i64, scratch_operands = 0 : i64, tpu.core_type = #tpu.core_type<tc>, window_params = [{transform_indices = @transform_0, window_bounds = array<i64: 8, 128>}, {transform_indices = @transform_1, window_bounds = array<i64: 8, 8>}, {transform_indices = @transform_2, window_bounds = array<i64: 8, 128>}, {pipeline_mode = #tpu.pipeline_mode<synchronous>, transform_indices = @transform_3, window_bounds = array<i64: 128, 1024>}, {pipeline_mode = #tpu.pipeline_mode<synchronous>, transform_indices = @transform_4, window_bounds = array<i64: 8, 128>}, {pipeline_mode = #tpu.pipeline_mode<synchronous>, transform_indices = @transform_5, window_bounds = array<i64: 128, 128>}, {pipeline_mode = #tpu.pipeline_mode<synchronous>, transform_indices = @transform_6, window_bounds = array<i64: 128, 128>}, {pipeline_mode = #tpu.pipeline_mode<synchronous>, transform_indices = @transform_7, window_bounds = array<i64: 128, 128>}, {pipeline_mode = #tpu.pipeline_mode<synchronous>, transform_indices = @transform_8, window_bounds = array<i64: 128, 64>}, {pipeline_mode = #tpu.pipeline_mode<synchronous>, transform_indices = @transform_9, window_bounds = array<i64: 64, 128>}, {pipeline_mode = #tpu.pipeline_mode<synchronous>, transform_indices = @transform_10, window_bounds = array<i64: 5, 128>}, {transform_indices = @transform_11, window_bounds = array<i64: 8, 128>}]} {
    %c0 = arith.constant 0 : index
    %c0_0 = arith.constant 0 : index
    %0 = vector.load %arg1[%c0, %c0_0] : memref<8x128xf32, #tpu.memory_space<vmem>>, vector<8x128xf32>
    %1 = tpu.iota {dimensions = array<i32: 1>} : vector<8x128xi32>
    %c64_i32 = arith.constant 64 : i32
    %2 = vector.broadcast %c64_i32 : i32 to vector<8x128xi32>
    %3 = arith.cmpi slt, %1, %2 : vector<8x128xi32>
    %c0_1 = arith.constant 0 : index
    %c0_2 = arith.constant 0 : index
    %4 = vector.load %arg11[%c0_1, %c0_2] : memref<5x128xf32, #tpu.memory_space<vmem>>, vector<1x128xf32>
    %c1 = arith.constant 1 : index
    %c0_3 = arith.constant 0 : index
    %5 = vector.load %arg11[%c1, %c0_3] : memref<5x128xf32, #tpu.memory_space<vmem>>, vector<1x128xf32>
    %c2 = arith.constant 2 : index
    %c0_4 = arith.constant 0 : index
    %6 = vector.load %arg11[%c2, %c0_4] : memref<5x128xf32, #tpu.memory_space<vmem>>, vector<1x128xf32>
    %c3 = arith.constant 3 : index
    %c0_5 = arith.constant 0 : index
    %7 = vector.load %arg11[%c3, %c0_5] : memref<5x128xf32, #tpu.memory_space<vmem>>, vector<1x64xf32>
    %c4 = arith.constant 4 : index
    %c0_6 = arith.constant 0 : index
    %8 = vector.load %arg11[%c4, %c0_6] : memref<5x128xf32, #tpu.memory_space<vmem>>, vector<1x128xf32>
    %c0_7 = arith.constant 0 : index
    %c0_8 = arith.constant 0 : index
    %9 = vector.load %arg2[%c0_7, %c0_8] : memref<8x8xf32, #tpu.memory_space<vmem>>, vector<8x8xf32>
    %10 = math.tanh %9 : vector<8x8xf32>
    %cst = arith.constant 3.14159274 : f32
    %11 = vector.broadcast %cst : f32 to vector<8x8xf32>
    %12 = arith.mulf %10, %11 : vector<8x8xf32>
    %c0_9 = arith.constant 0 : index
    %c0_10 = arith.constant 0 : index
    %13 = vector.load %arg4[%c0_9, %c0_10] : memref<128x1024xf32, #tpu.memory_space<vmem>>, vector<128x1024xf32>
    %cst_11 = arith.constant dense<0.000000e+00> : vector<8x1024xf32>
    %14 = tpu.matmul %0, %13, %cst_11 {dimension_numbers = #tpu.dot_dimension_numbers<[1], [0], [0], [1], [0, 0, 1, 1], [], []>} : vector<8x128xf32>, vector<128x1024xf32>, vector<8x1024xf32> -> vector<8x1024xf32>
    %cst_12 = arith.constant 0.000000e+00 : f32
    %15 = vector.broadcast %cst_12 : f32 to vector<8x128xf32>
    %16 = vector.extract_strided_slice %12 {offsets = [0, 0], sizes = [8, 1], strides = [1, 1]} : vector<8x8xf32> to vector<8x1xf32>
    %17 = vector.extract_strided_slice %14 {offsets = [0, 0], sizes = [8, 128], strides = [1, 1]} : vector<8x1024xf32> to vector<8x128xf32>
    %18 = vector.broadcast %16 : vector<8x1xf32> to vector<8x128xf32>
    %19 = arith.mulf %18, %17 : vector<8x128xf32>
    %20 = arith.addf %15, %19 : vector<8x128xf32>
    %21 = vector.extract_strided_slice %12 {offsets = [0, 1], sizes = [8, 1], strides = [1, 1]} : vector<8x8xf32> to vector<8x1xf32>
    %22 = vector.extract_strided_slice %14 {offsets = [0, 128], sizes = [8, 128], strides = [1, 1]} : vector<8x1024xf32> to vector<8x128xf32>
    %23 = vector.broadcast %21 : vector<8x1xf32> to vector<8x128xf32>
    %24 = arith.mulf %23, %22 : vector<8x128xf32>
    %25 = arith.addf %20, %24 : vector<8x128xf32>
    %26 = vector.extract_strided_slice %12 {offsets = [0, 2], sizes = [8, 1], strides = [1, 1]} : vector<8x8xf32> to vector<8x1xf32>
    %27 = vector.extract_strided_slice %14 {offsets = [0, 256], sizes = [8, 128], strides = [1, 1]} : vector<8x1024xf32> to vector<8x128xf32>
    %28 = vector.broadcast %26 : vector<8x1xf32> to vector<8x128xf32>
    %29 = arith.mulf %28, %27 : vector<8x128xf32>
    %30 = arith.addf %25, %29 : vector<8x128xf32>
    %31 = vector.extract_strided_slice %12 {offsets = [0, 3], sizes = [8, 1], strides = [1, 1]} : vector<8x8xf32> to vector<8x1xf32>
    %32 = vector.extract_strided_slice %14 {offsets = [0, 384], sizes = [8, 128], strides = [1, 1]} : vector<8x1024xf32> to vector<8x128xf32>
    %33 = vector.broadcast %31 : vector<8x1xf32> to vector<8x128xf32>
    %34 = arith.mulf %33, %32 : vector<8x128xf32>
    %35 = arith.addf %30, %34 : vector<8x128xf32>
    %36 = vector.extract_strided_slice %12 {offsets = [0, 4], sizes = [8, 1], strides = [1, 1]} : vector<8x8xf32> to vector<8x1xf32>
    %37 = vector.extract_strided_slice %14 {offsets = [0, 512], sizes = [8, 128], strides = [1, 1]} : vector<8x1024xf32> to vector<8x128xf32>
    %38 = vector.broadcast %36 : vector<8x1xf32> to vector<8x128xf32>
    %39 = arith.mulf %38, %37 : vector<8x128xf32>
    %40 = arith.addf %35, %39 : vector<8x128xf32>
    %41 = vector.extract_strided_slice %12 {offsets = [0, 5], sizes = [8, 1], strides = [1, 1]} : vector<8x8xf32> to vector<8x1xf32>
    %42 = vector.extract_strided_slice %14 {offsets = [0, 640], sizes = [8, 128], strides = [1, 1]} : vector<8x1024xf32> to vector<8x128xf32>
    %43 = vector.broadcast %41 : vector<8x1xf32> to vector<8x128xf32>
    %44 = arith.mulf %43, %42 : vector<8x128xf32>
    %45 = arith.addf %40, %44 : vector<8x128xf32>
    %46 = vector.extract_strided_slice %12 {offsets = [0, 6], sizes = [8, 1], strides = [1, 1]} : vector<8x8xf32> to vector<8x1xf32>
    %47 = vector.extract_strided_slice %14 {offsets = [0, 768], sizes = [8, 128], strides = [1, 1]} : vector<8x1024xf32> to vector<8x128xf32>
    %48 = vector.broadcast %46 : vector<8x1xf32> to vector<8x128xf32>
    %49 = arith.mulf %48, %47 : vector<8x128xf32>
    %50 = arith.addf %45, %49 : vector<8x128xf32>
    %51 = vector.extract_strided_slice %12 {offsets = [0, 7], sizes = [8, 1], strides = [1, 1]} : vector<8x8xf32> to vector<8x1xf32>
    %52 = vector.extract_strided_slice %14 {offsets = [0, 896], sizes = [8, 128], strides = [1, 1]} : vector<8x1024xf32> to vector<8x128xf32>
    %53 = vector.broadcast %51 : vector<8x1xf32> to vector<8x128xf32>
    %54 = arith.mulf %53, %52 : vector<8x128xf32>
    %55 = arith.addf %50, %54 : vector<8x128xf32>
    %c0_13 = arith.constant 0 : index
    %c0_14 = arith.constant 0 : index
    %56 = vector.load %arg5[%c0_13, %c0_14] : memref<8x128xf32, #tpu.memory_space<vmem>>, vector<8x128xf32>
    %cst_15 = arith.constant dense<0.000000e+00> : vector<8x128xf32>
    %57 = tpu.matmul %12, %56, %cst_15 {dimension_numbers = #tpu.dot_dimension_numbers<[1], [0], [0], [1], [0, 0, 1, 1], [], []>} : vector<8x8xf32>, vector<8x128xf32>, vector<8x128xf32> -> vector<8x128xf32>
    %58 = arith.addf %55, %57 : vector<8x128xf32>
    %cst_16 = arith.constant dense<0.000000e+00> : vector<8xf32>
    %59 = vector.multi_reduction <add>, %58, %cst_16 [1] : vector<8x128xf32> to vector<8xf32>
    %60 = vector.shape_cast %59 : vector<8xf32> to vector<8x1xf32>
    %cst_17 = arith.constant 1.280000e+02 : f32
    %61 = vector.broadcast %cst_17 : f32 to vector<8x1xf32>
    %62 = arith.divf %60, %61 : vector<8x1xf32>
    %63 = arith.mulf %58, %58 : vector<8x128xf32>
    %cst_18 = arith.constant dense<0.000000e+00> : vector<8xf32>
    %64 = vector.multi_reduction <add>, %63, %cst_18 [1] : vector<8x128xf32> to vector<8xf32>
    %65 = vector.shape_cast %64 : vector<8xf32> to vector<8x1xf32>
    %cst_19 = arith.constant 1.280000e+02 : f32
    %66 = vector.broadcast %cst_19 : f32 to vector<8x1xf32>
    %67 = arith.divf %65, %66 : vector<8x1xf32>
    %68 = arith.mulf %62, %62 : vector<8x1xf32>
    %69 = arith.subf %67, %68 : vector<8x1xf32>
    %70 = vector.broadcast %62 : vector<8x1xf32> to vector<8x128xf32>
    %71 = arith.subf %58, %70 : vector<8x128xf32>
    %cst_20 = arith.constant 9.99999974E-6 : f32
    %72 = vector.broadcast %cst_20 : f32 to vector<8x1xf32>
    %73 = arith.addf %69, %72 : vector<8x1xf32>
    %74 = math.rsqrt %73 : vector<8x1xf32>
    %75 = vector.broadcast %74 : vector<8x1xf32> to vector<8x128xf32>
    %76 = arith.mulf %71, %75 : vector<8x128xf32>
    %c0_21 = arith.constant 0 : index
    %c0_22 = arith.constant 0 : index
    %77 = vector.load %arg3[%c0_21, %c0_22] : memref<8x128xf32, #tpu.memory_space<vmem>>, vector<8x128xf32>
    %78 = math.tanh %77 : vector<8x128xf32>
    %cst_23 = arith.constant 3.14159274 : f32
    %79 = vector.broadcast %cst_23 : f32 to vector<8x128xf32>
    %80 = arith.mulf %78, %79 : vector<8x128xf32>
    %cst_24 = arith.constant 2.000000e+00 : f32
    %81 = vector.broadcast %cst_24 : f32 to vector<8x128xf32>
    %82 = arith.mulf %81, %77 : vector<8x128xf32>
    %83 = math.tanh %82 : vector<8x128xf32>
    %cst_25 = arith.constant 1.57079637 : f32
    %84 = vector.broadcast %cst_25 : f32 to vector<8x128xf32>
    %85 = arith.mulf %83, %84 : vector<8x128xf32>
    %cst_26 = arith.constant 1.57079637 : f32
    %86 = vector.broadcast %cst_26 : f32 to vector<8x128xf32>
    %87 = arith.addf %85, %86 : vector<8x128xf32>
    %88 = arith.select %3, %80, %87 : vector<8x128xi1>, vector<8x128xf32>
    %89 = arith.addf %0, %88 : vector<8x128xf32>
    %c0_27 = arith.constant 0 : index
    %c0_28 = arith.constant 0 : index
    %90 = vector.load %arg6[%c0_27, %c0_28] : memref<128x128xf32, #tpu.memory_space<vmem>>, vector<128x128xf32>
    %cst_29 = arith.constant dense<0.000000e+00> : vector<8x128xf32>
    %91 = tpu.matmul %89, %90, %cst_29 {dimension_numbers = #tpu.dot_dimension_numbers<[1], [0], [0], [1], [0, 0, 1, 1], [], []>} : vector<8x128xf32>, vector<128x128xf32>, vector<8x128xf32> -> vector<8x128xf32>
    %92 = vector.broadcast %4 : vector<1x128xf32> to vector<8x128xf32>
    %93 = arith.addf %91, %92 : vector<8x128xf32>
    %cst_30 = arith.constant 0.000000e+00 : f32
    %94 = vector.broadcast %cst_30 : f32 to vector<8x128xf32>
    %95 = arith.maximumf %93, %94 : vector<8x128xf32>
    %c0_31 = arith.constant 0 : index
    %c0_32 = arith.constant 0 : index
    %96 = vector.load %arg7[%c0_31, %c0_32] : memref<128x128xf32, #tpu.memory_space<vmem>>, vector<128x128xf32>
    %cst_33 = arith.constant dense<0.000000e+00> : vector<8x128xf32>
    %97 = tpu.matmul %95, %96, %cst_33 {dimension_numbers = #tpu.dot_dimension_numbers<[1], [0], [0], [1], [0, 0, 1, 1], [], []>} : vector<8x128xf32>, vector<128x128xf32>, vector<8x128xf32> -> vector<8x128xf32>
    %98 = vector.broadcast %5 : vector<1x128xf32> to vector<8x128xf32>
    %99 = arith.addf %97, %98 : vector<8x128xf32>
    %cst_34 = arith.constant 0.000000e+00 : f32
    %100 = vector.broadcast %cst_34 : f32 to vector<8x128xf32>
    %101 = arith.maximumf %99, %100 : vector<8x128xf32>
    %c0_35 = arith.constant 0 : index
    %c0_36 = arith.constant 0 : index
    %102 = vector.load %arg8[%c0_35, %c0_36] : memref<128x128xf32, #tpu.memory_space<vmem>>, vector<128x128xf32>
    %cst_37 = arith.constant dense<0.000000e+00> : vector<8x128xf32>
    %103 = tpu.matmul %101, %102, %cst_37 {dimension_numbers = #tpu.dot_dimension_numbers<[1], [0], [0], [1], [0, 0, 1, 1], [], []>} : vector<8x128xf32>, vector<128x128xf32>, vector<8x128xf32> -> vector<8x128xf32>
    %104 = vector.broadcast %6 : vector<1x128xf32> to vector<8x128xf32>
    %105 = arith.addf %103, %104 : vector<8x128xf32>
    %cst_38 = arith.constant dense<0.000000e+00> : vector<8xf32>
    %106 = vector.multi_reduction <add>, %105, %cst_38 [1] : vector<8x128xf32> to vector<8xf32>
    %107 = vector.shape_cast %106 : vector<8xf32> to vector<8x1xf32>
    %cst_39 = arith.constant 1.280000e+02 : f32
    %108 = vector.broadcast %cst_39 : f32 to vector<8x1xf32>
    %109 = arith.divf %107, %108 : vector<8x1xf32>
    %110 = arith.mulf %105, %105 : vector<8x128xf32>
    %cst_40 = arith.constant dense<0.000000e+00> : vector<8xf32>
    %111 = vector.multi_reduction <add>, %110, %cst_40 [1] : vector<8x128xf32> to vector<8xf32>
    %112 = vector.shape_cast %111 : vector<8xf32> to vector<8x1xf32>
    %cst_41 = arith.constant 1.280000e+02 : f32
    %113 = vector.broadcast %cst_41 : f32 to vector<8x1xf32>
    %114 = arith.divf %112, %113 : vector<8x1xf32>
    %115 = arith.mulf %109, %109 : vector<8x1xf32>
    %116 = arith.subf %114, %115 : vector<8x1xf32>
    %117 = vector.broadcast %109 : vector<8x1xf32> to vector<8x128xf32>
    %118 = arith.subf %105, %117 : vector<8x128xf32>
    %cst_42 = arith.constant 9.99999974E-6 : f32
    %119 = vector.broadcast %cst_42 : f32 to vector<8x1xf32>
    %120 = arith.addf %116, %119 : vector<8x1xf32>
    %121 = math.rsqrt %120 : vector<8x1xf32>
    %122 = vector.broadcast %121 : vector<8x1xf32> to vector<8x128xf32>
    %123 = arith.mulf %118, %122 : vector<8x128xf32>
    %124 = tpu.concatenate %76, %123 in 0 : vector<8x128xf32>, vector<8x128xf32> -> vector<16x128xf32>
    %c0_43 = arith.constant 0 : index
    %c0_44 = arith.constant 0 : index
    %125 = vector.load %arg9[%c0_43, %c0_44] : memref<128x64xf32, #tpu.memory_space<vmem>>, vector<128x64xf32>
    %cst_45 = arith.constant dense<0.000000e+00> : vector<16x64xf32>
    %126 = tpu.matmul %124, %125, %cst_45 {dimension_numbers = #tpu.dot_dimension_numbers<[1], [0], [0], [1], [0, 0, 1, 1], [], []>} : vector<16x128xf32>, vector<128x64xf32>, vector<16x64xf32> -> vector<16x64xf32>
    %127 = vector.broadcast %7 : vector<1x64xf32> to vector<16x64xf32>
    %128 = arith.addf %126, %127 : vector<16x64xf32>
    %cst_46 = arith.constant 0.000000e+00 : f32
    %129 = vector.broadcast %cst_46 : f32 to vector<16x64xf32>
    %130 = arith.maximumf %128, %129 : vector<16x64xf32>
    %c0_47 = arith.constant 0 : index
    %c0_48 = arith.constant 0 : index
    %131 = vector.load %arg10[%c0_47, %c0_48] : memref<64x128xf32, #tpu.memory_space<vmem>>, vector<64x128xf32>
    %cst_49 = arith.constant dense<0.000000e+00> : vector<16x128xf32>
    %132 = tpu.matmul %130, %131, %cst_49 {dimension_numbers = #tpu.dot_dimension_numbers<[1], [0], [0], [1], [0, 0, 1, 1], [], []>} : vector<16x64xf32>, vector<64x128xf32>, vector<16x128xf32> -> vector<16x128xf32>
    %133 = vector.broadcast %8 : vector<1x128xf32> to vector<16x128xf32>
    %134 = arith.addf %132, %133 : vector<16x128xf32>
    %135 = vector.extract_strided_slice %134 {offsets = [0, 0], sizes = [8, 128], strides = [1, 1]} : vector<16x128xf32> to vector<8x128xf32>
    %136 = vector.extract_strided_slice %134 {offsets = [8, 0], sizes = [8, 128], strides = [1, 1]} : vector<16x128xf32> to vector<8x128xf32>
    %137 = arith.maximumf %135, %136 : vector<8x128xf32>
    %138 = arith.subf %135, %137 : vector<8x128xf32>
    %139 = math.exp %138 : vector<8x128xf32>
    %140 = arith.subf %136, %137 : vector<8x128xf32>
    %141 = math.exp %140 : vector<8x128xf32>
    %142 = arith.addf %139, %141 : vector<8x128xf32>
    %143 = tpu.reciprocal %142 {approx = true} : vector<8x128xf32> -> vector<8x128xf32>
    %144 = arith.mulf %139, %143 : vector<8x128xf32>
    %145 = arith.mulf %144, %76 : vector<8x128xf32>
    %146 = arith.mulf %141, %143 : vector<8x128xf32>
    %147 = arith.mulf %146, %123 : vector<8x128xf32>
    %148 = arith.addf %145, %147 : vector<8x128xf32>
    %149 = math.tanh %148 : vector<8x128xf32>
    %cst_50 = arith.constant 3.14159274 : f32
    %150 = vector.broadcast %cst_50 : f32 to vector<8x128xf32>
    %151 = arith.mulf %149, %150 : vector<8x128xf32>
    %cst_51 = arith.constant 2.000000e+00 : f32
    %152 = vector.broadcast %cst_51 : f32 to vector<8x128xf32>
    %153 = arith.mulf %152, %148 : vector<8x128xf32>
    %154 = math.tanh %153 : vector<8x128xf32>
    %cst_52 = arith.constant 1.57079637 : f32
    %155 = vector.broadcast %cst_52 : f32 to vector<8x128xf32>
    %156 = arith.mulf %154, %155 : vector<8x128xf32>
    %cst_53 = arith.constant 1.57079637 : f32
    %157 = vector.broadcast %cst_53 : f32 to vector<8x128xf32>
    %158 = arith.addf %156, %157 : vector<8x128xf32>
    %159 = arith.select %3, %151, %158 : vector<8x128xi1>, vector<8x128xf32>
    %c0_54 = arith.constant 0 : index
    %c0_55 = arith.constant 0 : index
    %160 = vector.load %arg12[%c0_54, %c0_55] : memref<8x128xf32, #tpu.memory_space<vmem>>, vector<8x128xf32>
    tpu.vector_store %arg12[%c0_54, %c0_55], %159 {strides = array<i32>} : memref<8x128xf32, #tpu.memory_space<vmem>>, vector<8x128xf32>,
    return
  }
  func.func @transform_0(%arg0: i32) -> (i32, i32) {
    %c0_i32 = arith.constant 0 : i32
    %c0_i32_0 = arith.constant 0 : i32
    return %arg0, %c0_i32 : i32, i32
  }
  func.func @transform_1(%arg0: i32) -> (i32, i32) {
    %c0_i32 = arith.constant 0 : i32
    %c0_i32_0 = arith.constant 0 : i32
    return %arg0, %c0_i32 : i32, i32
  }
  func.func @transform_2(%arg0: i32) -> (i32, i32) {
    %c0_i32 = arith.constant 0 : i32
    %c0_i32_0 = arith.constant 0 : i32
    return %arg0, %c0_i32 : i32, i32
  }
  func.func @transform_3(%arg0: i32) -> (i32, i32) {
    %c0_i32 = arith.constant 0 : i32
    %c0_i32_0 = arith.constant 0 : i32
    %c0_i32_1 = arith.constant 0 : i32
    return %c0_i32, %c0_i32_0 : i32, i32
  }
  func.func @transform_4(%arg0: i32) -> (i32, i32) {
    %c0_i32 = arith.constant 0 : i32
    %c0_i32_0 = arith.constant 0 : i32
    %c0_i32_1 = arith.constant 0 : i32
    return %c0_i32, %c0_i32_0 : i32, i32
  }
  func.func @transform_5(%arg0: i32) -> (i32, i32) {
    %c0_i32 = arith.constant 0 : i32
    %c0_i32_0 = arith.constant 0 : i32
    %c0_i32_1 = arith.constant 0 : i32
    return %c0_i32, %c0_i32_0 : i32, i32
  }
  func.func @transform_6(%arg0: i32) -> (i32, i32) {
    %c0_i32 = arith.constant 0 : i32
    %c0_i32_0 = arith.constant 0 : i32
    %c0_i32_1 = arith.constant 0 : i32
    return %c0_i32, %c0_i32_0 : i32, i32
  }
  func.func @transform_7(%arg0: i32) -> (i32, i32) {
    %c0_i32 = arith.constant 0 : i32
    %c0_i32_0 = arith.constant 0 : i32
    %c0_i32_1 = arith.constant 0 : i32
    return %c0_i32, %c0_i32_0 : i32, i32
  }
  func.func @transform_8(%arg0: i32) -> (i32, i32) {
    %c0_i32 = arith.constant 0 : i32
    %c0_i32_0 = arith.constant 0 : i32
    %c0_i32_1 = arith.constant 0 : i32
    return %c0_i32, %c0_i32_0 : i32, i32
  }
  func.func @transform_9(%arg0: i32) -> (i32, i32) {
    %c0_i32 = arith.constant 0 : i32
    %c0_i32_0 = arith.constant 0 : i32
    %c0_i32_1 = arith.constant 0 : i32
    return %c0_i32, %c0_i32_0 : i32, i32
  }
  func.func @transform_10(%arg0: i32) -> (i32, i32) {
    %c0_i32 = arith.constant 0 : i32
    %c0_i32_0 = arith.constant 0 : i32
    %c0_i32_1 = arith.constant 0 : i32
    return %c0_i32, %c0_i32_0 : i32, i32
  }
  func.func @transform_11(%arg0: i32) -> (i32, i32) {
    %c0_i32 = arith.constant 0 : i32
    %c0_i32_0 = arith.constant 0 : i32
    return %arg0, %c0_i32 : i32, i32
  }
}

</mosaic_0001>

<bundles_post_ra>
// kernel: tpu_custom_call.1
= control target key start
LH: loop header
LB: loop body
LE: loop exit
PB: predicated region body
PF: predicated region fallthrough
CT: control target
= control target key end

     0   :  { %16 = vsyncpa [#allocation3], 0  ;;  %s1997_s0 = inlined_call_operand.vmem [shape: f32[8,128], index: 0, kind: input, shape index: {}]   ;;  %s1998_s1 = inlined_call_operand.hbm [shape: f32[8,8], index: 1, kind: input, shape index: {}]   ;;  %s1999_s2 = inlined_call_operand.hbm [shape: f32[8,128], index: 2, kind: input, shape index: {}]   ;;  %s2000_s3 = inlined_call_operand.hbm [shape: f32[128,1024], index: 3, kind: input, shape index: {}]   ;;  %s2001_s4 = inlined_call_operand.hbm [shape: f32[8,128], index: 4, kind: input, shape index: {}]   ;;  %s2002_s5 = inlined_call_operand.vmem [shape: f32[128,128], index: 5, kind: input, shape index: {}]   ;;  %s2003_s6 = inlined_call_operand.hbm [shape: f32[128,128], index: 6, kind: input, shape index: {}]   ;;  %s2004_s7 = inlined_call_operand.hbm [shape: f32[128,128], index: 7, kind: input, shape index: {}]   ;;  %s2005_s8 = inlined_call_operand.vmem [shape: f32[128,64], index: 8, kind: input, shape index: {}]   ;;  %s2006_s9 = inlined_call_operand.vmem [shape: f32[64,128], index: 9, kind: input, shape index: {}]   ;;  %s2007_s10 = inlined_call_operand.vmem [shape: f32[5,128], index: 10, kind: input, shape index: {}]   ;;  %s2008_s11 = inlined_call_operand.hbm [shape: f32[8,128], index: 11, kind: output, shape index: {}]  }
   0x1   :  { %17 = vsyncpa [#allocation6], 0 }
   0x2   :  { %18 = vsyncpa [#allocation9], 0 }
   0x3   :  { %19 = vsyncpa [#allocation12], 0 }
   0x4   :  { %20 = vsyncpa [#allocation4], 0  ;;  %s1655_s17 = smov [#allocation5]   ;;  %s1656_s19 = smov [#allocation8]  }
   0x5   :  { %s39_s18 = sshll.u32 %s1655_s17, 4  ;;  %s61_s20 = sshll.u32 %s1656_s19, 4  ;;  %s40_s18 = int_to_ptr.vmem [resolvable:$true] %s39_s18  ;;  %s62_s20 = int_to_ptr.vmem [resolvable:$true] %s61_s20 }
   0x6   :  { %s1513_s21 = scalar_lea.vmem %s40_s18, 128  ;;  %p1518_p1 = scmp.lt.s32.totalorder %s40_s18, %s40_s18 }
   0x7   :  { %p1514_p0 = scmp.ne.s32.totalorder %s40_s18, %s1513_s21  ;;  %p1519_p2 = scmp.lt.s32.totalorder %s1513_s21, %s1513_s21 }
   0x9   :  { %p1520_p3 = por %p1519_p2, %p1518_p1 }
   0xb   :  { %p1521_p4 = pnand %p1520_p3, %p1514_p0 }
   0xd   :  { %1524 = shalt.err (!%p1521_p4)
}
   0xe   :  { %42 = dma.hbm_to_vmem [thread:$0]  %s1999_s2, 128, %s40_s18, [#allocation6]  }
   0xf   :  { %s1533_s24 = scalar_lea.vmem %s62_s20, 128  ;;  %p1538_p6 = scmp.lt.s32.totalorder %s62_s20, %s62_s20 }
  0x10   :  { %p1534_p5 = scmp.ne.s32.totalorder %s62_s20, %s1533_s24  ;;  %p1539_p7 = scmp.lt.s32.totalorder %s1533_s24, %s1533_s24 }
  0x12   :  { %p1540_p8 = por %p1539_p7, %p1538_p6 }
  0x14   :  { %p1541_p9 = pnand %p1540_p8, %p1534_p5 }
  0x16   :  { %1544 = shalt.err (!%p1541_p9)
}
  0x17   :  { %64 = dma.hbm_to_vmem [thread:$0]  %s2001_s4, 128, %s62_s20, [#allocation9]  }
  0x18   :  { %s1657_s27 = smov [#allocation2]   ;;  %s1658_s29 = smov [#allocation7]  }
  0x19   :  { %s29_s28 = sshll.u32 %s1657_s27, 4  ;;  %s48_s30 = sshll.u32 %s1658_s29, 4  ;;  %s30_s28 = int_to_ptr.vmem [resolvable:$true] %s29_s28  ;;  %s49_s30 = int_to_ptr.vmem [resolvable:$true] %s48_s30 }
  0x1a   :  { %s1553_s12 = scalar_lea.vmem %s30_s28, 128  ;;  %p1558_p11 = scmp.lt.s32.totalorder %s30_s28, %s30_s28 }
  0x1b   :  { %p1554_p10 = scmp.ne.s32.totalorder %s30_s28, %s1553_s12  ;;  %p1559_p12 = scmp.lt.s32.totalorder %s1553_s12, %s1553_s12 }
  0x1d   :  { %p1560_p13 = por %p1559_p12, %p1558_p11 }
  0x1f   :  { %p1561_p0 = pnand %p1560_p13, %p1554_p10 }
  0x21   :  { %1564 = shalt.err (!%p1561_p0)
}
  0x22   :  { %32 = dma.hbm_to_vmem [thread:$0]  %s1998_s1, 128, %s30_s28, [#allocation3]  }
  0x23   :  { %s1573_s14 = scalar_lea.vmem %s49_s30, 16384  ;;  %p1578_p2 = scmp.lt.s32.totalorder %s49_s30, %s49_s30 }
  0x24   :  { %p1574_p1 = scmp.ne.s32.totalorder %s49_s30, %s1573_s14  ;;  %p1579_p3 = scmp.lt.s32.totalorder %s1573_s14, %s1573_s14 }
  0x26   :  { %p1580_p4 = por %p1579_p3, %p1578_p2 }
  0x28   :  { %p1581_p5 = pnand %p1580_p4, %p1574_p1 }
  0x2a   :  { %1584 = shalt.err (!%p1581_p5)
}
  0x2b   :  { %s1659_s4 = smov 1024   ;;  %s1660_s15 = smov 64  }
  0x2c   :  { %54 = dma.hbm_to_vmem [thread:$0]  %s2000_s3, 16384, %s49_s30, [#allocation6], %s1659_s4, %s1659_s4, %s1660_s15  }
  0x2d   :  { %s1661_s18 = smov [#allocation10]  }
  0x2e   :  { %s72_s19 = sshll.u32 %s1661_s18, 4  ;;  %s73_s19 = int_to_ptr.vmem [resolvable:$true] %s72_s19 }
  0x2f   :  { %s1593_s20 = scalar_lea.vmem %s73_s19, 2048  ;;  %p1598_p7 = scmp.lt.s32.totalorder %s73_s19, %s73_s19 }
  0x30   :  { %p1594_p6 = scmp.ne.s32.totalorder %s73_s19, %s1593_s20  ;;  %p1599_p8 = scmp.lt.s32.totalorder %s1593_s20, %s1593_s20 }
  0x32   :  { %p1600_p9 = por %p1599_p8, %p1598_p7 }
  0x34   :  { %p1601_p10 = pnand %p1600_p9, %p1594_p6 }
  0x36   :  { %1604 = shalt.err (!%p1601_p10)
}
  0x37   :  { %s1662_s1 = smov 128   ;;  %s1663_s21 = smov 8  }
  0x38   :  { %78 = dma.hbm_to_vmem [thread:$0]  %s2003_s6, 2048, %s73_s19, [#allocation9], %s1662_s1, %s1662_s1, %s1663_s21  }
  0x39   :  { %s1664_s24 = smov [#allocation11]  }
  0x3a   :  { %s84_s25 = sshll.u32 %s1664_s24, 4  ;;  %s85_s25 = int_to_ptr.vmem [resolvable:$true] %s84_s25 }
  0x3b   :  { %s1613_s3 = scalar_lea.vmem %s85_s25, 2048  ;;  %p1618_p12 = scmp.lt.s32.totalorder %s85_s25, %s85_s25 }
  0x3c   :  { %p1614_p11 = scmp.ne.s32.totalorder %s85_s25, %s1613_s3  ;;  %p1619_p13 = scmp.lt.s32.totalorder %s1613_s3, %s1613_s3 }
  0x3e   :  { %p1620_p0 = por %p1619_p13, %p1618_p12 }
  0x40   :  { %p1621_p1 = pnand %p1620_p0, %p1614_p11 }
  0x42   :  { %1624 = shalt.err (!%p1621_p1)
}
  0x43   :  { %90 = dma.hbm_to_vmem [thread:$0]  %s2004_s7, 2048, %s85_s25, [#allocation12], %s1662_s1, %s1662_s1, %s1663_s21  }
  0x44   :  { %1645 = dma.done.wait [#allocation3], 128  }
  0x45   :  { %1646 = vsyncadd [#allocation3], 4294967168 }
  0x46   :  { %1647 = dma.done.wait [#allocation6], 16512  }
  0x47   :  { %1648 = vsyncadd [#allocation6], 4294950784 }
  0x48   :  { %1649 = dma.done.wait [#allocation9], 2176  }
  0x49   :  { %1650 = vsyncadd [#allocation9], 4294965120 }
  0x4a   :  { %1651 = dma.done.wait [#allocation12], 2048  }
  0x4b   :  { %1652 = vsyncadd [#allocation12], 4294965248  ;;  %v1665_v0 = vmov 0.0   ;;  %v1666_v1 = vmov 2   ;;  %v1667_v2 = vmov 0   ;;  %v248_v3 = vld [vmem:[#allocation7 + $0x3c8] sm:$0xff] }
  0x4c   :  { %319 = vmatprep.mubr.f32.mxu0 %v1665_v0  ;;  %390 = vmatprep.mubr.f32.mxu1 %v1665_v0  ;;  %v250_v4 = vld [vmem:[#allocation7 + $0x3d8] sm:$0xff]  ;;  %v247_v5 = vld [vmem:[#allocation7 + $0x3c0] sm:$0xff]  ;;  %v249_v6 = vld [vmem:[#allocation7 + $0x3d0] sm:$0xff]  ;;  %vm589_vm0 = vcmask 64512   ;;  %vm1668_vm1 = vmmov 0   ;;  %vm1080_vm3 = vcmask 523264  }
  0x4d   :  { %1478 = vset.pattern.permute.xlu1 %v1666_v1  ;;  %1476 = vset.pattern.permute.xlu0 %v1667_v2  ;;  %v240_v7 = vld [vmem:[#allocation7 + $0x388] sm:$0xff]  ;;  %v242_v8 = vld [vmem:[#allocation7 + $0x398] sm:$0xff]  ;;  %v239_v9 = vld [vmem:[#allocation7 + $0x380] sm:$0xff] }
  0x4e   :  { %255 = vmatprep.subr.mxu0 %v248_v3  ;;  %326 = vmatprep.subr.mxu1 %v250_v4  ;;  %v241_v10 = vld [vmem:[#allocation7 + $0x390] sm:$0xff]  ;;  %v232_v11 = vld [vmem:[#allocation7 + $0x348] sm:$0xff]  ;;  %v234_v12 = vld [vmem:[#allocation7 + $0x358] sm:$0xff] }
  0x4f   :  { %256 = vmatpush1.msra.mxu0 %v247_v5  ;;  %327 = vmatpush1.msra.mxu1 %v249_v6  ;;  %v231_v13 = vld [vmem:[#allocation7 + $0x340] sm:$0xff]  ;;  %v233_v14 = vld [vmem:[#allocation7 + $0x350] sm:$0xff]  ;;  %v224_v15 = vld [vmem:[#allocation7 + $0x308] sm:$0xff] }
  0x50   :  { %257 = vmatprep.subr.mxu0 %v240_v7  ;;  %328 = vmatprep.subr.mxu1 %v242_v8  ;;  %v226_v16 = vld [vmem:[#allocation7 + $0x318] sm:$0xff]  ;;  %v223_v17 = vld [vmem:[#allocation7 + $0x300] sm:$0xff]  ;;  %v225_v18 = vld [vmem:[#allocation7 + $0x310] sm:$0xff] }
  0x51   :  { %258 = vmatpush1.msra.mxu0 %v239_v9  ;;  %329 = vmatpush1.msra.mxu1 %v241_v10  ;;  %v216_v19 = vld [vmem:[#allocation7 + $0x2c8] sm:$0xff]  ;;  %v218_v20 = vld [vmem:[#allocation7 + $0x2d8] sm:$0xff]  ;;  %v215_v21 = vld [vmem:[#allocation7 + $0x2c0] sm:$0xff] }
  0x52   :  { %259 = vmatprep.subr.mxu0 %v232_v11  ;;  %330 = vmatprep.subr.mxu1 %v234_v12  ;;  %v217_v22 = vld [vmem:[#allocation7 + $0x2d0] sm:$0xff]  ;;  %v208_v23 = vld [vmem:[#allocation7 + $0x288] sm:$0xff]  ;;  %v210_v24 = vld [vmem:[#allocation7 + $0x298] sm:$0xff] }
  0x53   :  { %260 = vmatpush1.msra.mxu0 %v231_v13  ;;  %331 = vmatpush1.msra.mxu1 %v233_v14  ;;  %v207_v25 = vld [vmem:[#allocation7 + $0x280] sm:$0xff]  ;;  %v209_v26 = vld [vmem:[#allocation7 + $0x290] sm:$0xff]  ;;  %v200_v27 = vld [vmem:[#allocation7 + $0x248] sm:$0xff] }
  0x54   :  { %261 = vmatprep.subr.mxu0 %v224_v15  ;;  %332 = vmatprep.subr.mxu1 %v226_v16  ;;  %v202_v28 = vld [vmem:[#allocation7 + $0x258] sm:$0xff]  ;;  %v199_v29 = vld [vmem:[#allocation7 + $0x240] sm:$0xff]  ;;  %v201_v30 = vld [vmem:[#allocation7 + $0x250] sm:$0xff] }
  0x55   :  { %262 = vmatpush1.msra.mxu0 %v223_v17  ;;  %333 = vmatpush1.msra.mxu1 %v225_v18  ;;  %v192_v31 = vld [vmem:[#allocation7 + $0x208] sm:$0xff]  ;;  %v194_v32 = vld [vmem:[#allocation7 + $0x218] sm:$0xff]  ;;  %v191_v33 = vld [vmem:[#allocation7 + $0x200] sm:$0xff] }
  0x56   :  { %263 = vmatprep.subr.mxu0 %v216_v19  ;;  %334 = vmatprep.subr.mxu1 %v218_v20  ;;  %v193_v34 = vld [vmem:[#allocation7 + $0x210] sm:$0xff]  ;;  %v184_v35 = vld [vmem:[#allocation7 + $0x1c8] sm:$0xff]  ;;  %v186_v36 = vld [vmem:[#allocation7 + $0x1d8] sm:$0xff] }
  0x57   :  { %264 = vmatpush1.msra.mxu0 %v215_v21  ;;  %335 = vmatpush1.msra.mxu1 %v217_v22  ;;  %v183_v37 = vld [vmem:[#allocation7 + $0x1c0] sm:$0xff]  ;;  %v185_v38 = vld [vmem:[#allocation7 + $0x1d0] sm:$0xff]  ;;  %v176_v39 = vld [vmem:[#allocation7 + $0x188] sm:$0xff] }
  0x58   :  { %265 = vmatprep.subr.mxu0 %v208_v23  ;;  %336 = vmatprep.subr.mxu1 %v210_v24  ;;  %v178_v40 = vld [vmem:[#allocation7 + $0x198] sm:$0xff]  ;;  %v175_v41 = vld [vmem:[#allocation7 + $0x180] sm:$0xff]  ;;  %v177_v42 = vld [vmem:[#allocation7 + $0x190] sm:$0xff] }
  0x59   :  { %266 = vmatpush1.msra.mxu0 %v207_v25  ;;  %337 = vmatpush1.msra.mxu1 %v209_v26  ;;  %v168_v43 = vld [vmem:[#allocation7 + $0x148] sm:$0xff]  ;;  %v170_v44 = vld [vmem:[#allocation7 + $0x158] sm:$0xff]  ;;  %v167_v45 = vld [vmem:[#allocation7 + $0x140] sm:$0xff] }
  0x5a   :  { %267 = vmatprep.subr.mxu0 %v200_v27  ;;  %338 = vmatprep.subr.mxu1 %v202_v28  ;;  %v169_v46 = vld [vmem:[#allocation7 + $0x150] sm:$0xff]  ;;  %v160_v47 = vld [vmem:[#allocation7 + $0x108] sm:$0xff]  ;;  %v162_v48 = vld [vmem:[#allocation7 + $0x118] sm:$0xff] }
  0x5b   :  { %268 = vmatpush1.msra.mxu0 %v199_v29  ;;  %339 = vmatpush1.msra.mxu1 %v201_v30  ;;  %v159_v49 = vld [vmem:[#allocation7 + $0x100] sm:$0xff]  ;;  %v161_v50 = vld [vmem:[#allocation7 + $0x110] sm:$0xff]  ;;  %v152_v51 = vld [vmem:[#allocation7 + $0xc8] sm:$0xff] }
  0x5c   :  { %269 = vmatprep.subr.mxu0 %v192_v31  ;;  %340 = vmatprep.subr.mxu1 %v194_v32  ;;  %v154_v52 = vld [vmem:[#allocation7 + $0xd8] sm:$0xff]  ;;  %v151_v53 = vld [vmem:[#allocation7 + $0xc0] sm:$0xff]  ;;  %v153_v54 = vld [vmem:[#allocation7 + $0xd0] sm:$0xff] }
  0x5d   :  { %270 = vmatpush1.msra.mxu0 %v191_v33  ;;  %341 = vmatpush1.msra.mxu1 %v193_v34  ;;  %v144_v55 = vld [vmem:[#allocation7 + $0x88] sm:$0xff]  ;;  %v146_v56 = vld [vmem:[#allocation7 + $0x98] sm:$0xff]  ;;  %v143_v57 = vld [vmem:[#allocation7 + $0x80] sm:$0xff] }
  0x5e   :  { %271 = vmatprep.subr.mxu0 %v184_v35  ;;  %342 = vmatprep.subr.mxu1 %v186_v36  ;;  %v145_v58 = vld [vmem:[#allocation7 + $0x90] sm:$0xff]  ;;  %v136_v59 = vld [vmem:[#allocation7 + $0x48] sm:$0xff]  ;;  %v138_v60 = vld [vmem:[#allocation7 + $0x58] sm:$0xff] }
  0x5f   :  { %272 = vmatpush1.msra.mxu0 %v183_v37  ;;  %343 = vmatpush1.msra.mxu1 %v185_v38  ;;  %v135_v61 = vld [vmem:[#allocation7 + $0x40] sm:$0xff]  ;;  %v137_v62 = vld [vmem:[#allocation7 + $0x50] sm:$0xff]  ;;  %v128_v63 = vld [vmem:[#allocation7 + $0x8] sm:$0xff] }
  0x60   :  { %273 = vmatprep.subr.mxu0 %v176_v39  ;;  %344 = vmatprep.subr.mxu1 %v178_v40  ;;  %v130_v1 = vld [vmem:[#allocation7 + $0x18] sm:$0xff]  ;;  %v127_v2 = vld [vmem:[#allocation7] sm:$0xff]  ;;  %v129_v3 = vld [vmem:[#allocation7 + $0x10] sm:$0xff] }
  0x61   :  { %274 = vmatpush1.msra.mxu0 %v175_v41  ;;  %345 = vmatpush1.msra.mxu1 %v177_v42  ;;  %v1759_v4 = vld [vmem:[%s1997_s0] sm:$0xff]  ;;  %v252_v5 = vld [vmem:[#allocation7 + $0x3e8] sm:$0xff]  ;;  %v254_v6 = vld [vmem:[#allocation7 + $0x3f8] sm:$0xff] }
  0x62   :  { %275 = vmatprep.subr.mxu0 %v168_v43  ;;  %346 = vmatprep.subr.mxu1 %v170_v44  ;;  %v251_v7 = vld [vmem:[#allocation7 + $0x3e0] sm:$0xff]  ;;  %v253_v8 = vld [vmem:[#allocation7 + $0x3f0] sm:$0xff]  ;;  %v244_v9 = vld [vmem:[#allocation7 + $0x3a8] sm:$0xff] }
  0x63   :  { %276 = vmatpush1.msra.mxu0 %v167_v45  ;;  %347 = vmatpush1.msra.mxu1 %v169_v46  ;;  %v246_v10 = vld [vmem:[#allocation7 + $0x3b8] sm:$0xff]  ;;  %v243_v11 = vld [vmem:[#allocation7 + $0x3a0] sm:$0xff]  ;;  %v245_v12 = vld [vmem:[#allocation7 + $0x3b0] sm:$0xff] }
  0x64   :  { %277 = vmatprep.subr.mxu0 %v160_v47  ;;  %348 = vmatprep.subr.mxu1 %v162_v48  ;;  %v236_v13 = vld [vmem:[#allocation7 + $0x368] sm:$0xff]  ;;  %v238_v14 = vld [vmem:[#allocation7 + $0x378] sm:$0xff]  ;;  %v235_v15 = vld [vmem:[#allocation7 + $0x360] sm:$0xff] }
  0x65   :  { %278 = vmatpush1.msra.mxu0 %v159_v49  ;;  %349 = vmatpush1.msra.mxu1 %v161_v50  ;;  %v237_v16 = vld [vmem:[#allocation7 + $0x370] sm:$0xff]  ;;  %v228_v17 = vld [vmem:[#allocation7 + $0x328] sm:$0xff]  ;;  %v230_v18 = vld [vmem:[#allocation7 + $0x338] sm:$0xff] }
  0x66   :  { %279 = vmatprep.subr.mxu0 %v152_v51  ;;  %350 = vmatprep.subr.mxu1 %v154_v52  ;;  %v227_v19 = vld [vmem:[#allocation7 + $0x320] sm:$0xff]  ;;  %v229_v20 = vld [vmem:[#allocation7 + $0x330] sm:$0xff]  ;;  %v220_v21 = vld [vmem:[#allocation7 + $0x2e8] sm:$0xff] }
  0x67   :  { %280 = vmatpush1.msra.mxu0 %v151_v53  ;;  %351 = vmatpush1.msra.mxu1 %v153_v54  ;;  %v222_v22 = vld [vmem:[#allocation7 + $0x2f8] sm:$0xff]  ;;  %v219_v23 = vld [vmem:[#allocation7 + $0x2e0] sm:$0xff]  ;;  %v221_v24 = vld [vmem:[#allocation7 + $0x2f0] sm:$0xff] }
  0x68   :  { %281 = vmatprep.subr.mxu0 %v144_v55  ;;  %352 = vmatprep.subr.mxu1 %v146_v56  ;;  %v212_v25 = vld [vmem:[#allocation7 + $0x2a8] sm:$0xff]  ;;  %v214_v26 = vld [vmem:[#allocation7 + $0x2b8] sm:$0xff]  ;;  %v211_v27 = vld [vmem:[#allocation7 + $0x2a0] sm:$0xff] }
  0x69   :  { %282 = vmatpush1.msra.mxu0 %v143_v57  ;;  %353 = vmatpush1.msra.mxu1 %v145_v58  ;;  %v213_v28 = vld [vmem:[#allocation7 + $0x2b0] sm:$0xff]  ;;  %v204_v29 = vld [vmem:[#allocation7 + $0x268] sm:$0xff]  ;;  %v206_v30 = vld [vmem:[#allocation7 + $0x278] sm:$0xff] }
  0x6a   :  { %283 = vmatprep.subr.mxu0 %v136_v59  ;;  %354 = vmatprep.subr.mxu1 %v138_v60  ;;  %v203_v31 = vld [vmem:[#allocation7 + $0x260] sm:$0xff]  ;;  %v205_v32 = vld [vmem:[#allocation7 + $0x270] sm:$0xff]  ;;  %v196_v33 = vld [vmem:[#allocation7 + $0x228] sm:$0xff] }
  0x6b   :  { %284 = vmatpush1.msra.mxu0 %v135_v61  ;;  %355 = vmatpush1.msra.mxu1 %v137_v62  ;;  %v198_v34 = vld [vmem:[#allocation7 + $0x238] sm:$0xff]  ;;  %v195_v35 = vld [vmem:[#allocation7 + $0x220] sm:$0xff]  ;;  %v197_v36 = vld [vmem:[#allocation7 + $0x230] sm:$0xff] }
  0x6c   :  { %285 = vmatprep.subr.mxu0 %v128_v63  ;;  %356 = vmatprep.subr.mxu1 %v130_v1  ;;  %v188_v37 = vld [vmem:[#allocation7 + $0x1e8] sm:$0xff]  ;;  %v190_v38 = vld [vmem:[#allocation7 + $0x1f8] sm:$0xff]  ;;  %v187_v39 = vld [vmem:[#allocation7 + $0x1e0] sm:$0xff] }
  0x6d   :  { %286 = vmatpush1.msra.mxu0 %v127_v2  ;;  %357 = vmatpush1.msra.mxu1 %v129_v3  ;;  %v189_v40 = vld [vmem:[#allocation7 + $0x1f0] sm:$0xff]  ;;  %v180_v42 = vld [vmem:[#allocation7 + $0x1a8] sm:$0xff]  ;;  %v182_v43 = vld [vmem:[#allocation7 + $0x1b8] sm:$0xff] }
  0x6e   :  { %320 = vmatmul.mubr.f32.vlgmr.msra.gmra.mxu0 %v1759_v4  ;;  %391 = vmatmul.mubr.f32.vlgmr.msra.gmra.mxu1 %v1759_v4  ;;  %v124_v41 = vld [vmem:[#allocation2] sm:$0xff]  ;;  %v179_v44 = vld [vmem:[#allocation7 + $0x1a0] sm:$0xff]  ;;  %v172_v46 = vld [vmem:[#allocation7 + $0x168] sm:$0xff] }
  0x6f   :  { %397 = vmatprep.subr.mxu0 %v252_v5  ;;  %468 = vmatprep.subr.mxu1 %v254_v6  ;;  %v181_v45 = vld [vmem:[#allocation7 + $0x1b0] sm:$0xff]  ;;  %v174_v47 = vld [vmem:[#allocation7 + $0x178] sm:$0xff]  ;;  %1485 = vtanh.f32 %v124_v41  ;;  %v171_v48 = vld [vmem:[#allocation7 + $0x160] sm:$0xff] }
  0x70   :  { %398 = vmatpush1.msra.mxu0 %v251_v7  ;;  %469 = vmatpush1.msra.mxu1 %v253_v8  ;;  %v173_v49 = vld [vmem:[#allocation7 + $0x170] sm:$0xff]  ;;  %v164_v50 = vld [vmem:[#allocation7 + $0x128] sm:$0xff]  ;;  %v166_v51 = vld [vmem:[#allocation7 + $0x138] sm:$0xff] }
  0x71   :  { %399 = vmatprep.subr.mxu0 %v244_v9  ;;  %470 = vmatprep.subr.mxu1 %v246_v10  ;;  %v163_v52 = vld [vmem:[#allocation7 + $0x120] sm:$0xff]  ;;  %v165_v53 = vld [vmem:[#allocation7 + $0x130] sm:$0xff]  ;;  %v156_v54 = vld [vmem:[#allocation7 + $0xe8] sm:$0xff] }
  0x72   :  { %400 = vmatpush1.msra.mxu0 %v243_v11  ;;  %471 = vmatpush1.msra.mxu1 %v245_v12  ;;  %v158_v55 = vld [vmem:[#allocation7 + $0xf8] sm:$0xff]  ;;  %v155_v56 = vld [vmem:[#allocation7 + $0xe0] sm:$0xff]  ;;  %v157_v57 = vld [vmem:[#allocation7 + $0xf0] sm:$0xff] }
  0x73   :  { %401 = vmatprep.subr.mxu0 %v236_v13  ;;  %472 = vmatprep.subr.mxu1 %v238_v14  ;;  %v148_v58 = vld [vmem:[#allocation7 + $0xa8] sm:$0xff]  ;;  %v150_v59 = vld [vmem:[#allocation7 + $0xb8] sm:$0xff]  ;;  %v147_v60 = vld [vmem:[#allocation7 + $0xa0] sm:$0xff] }
  0x74   :  { %402 = vmatpush1.msra.mxu0 %v235_v15  ;;  %473 = vmatpush1.msra.mxu1 %v237_v16  ;;  %v149_v61 = vld [vmem:[#allocation7 + $0xb0] sm:$0xff]  ;;  %v140_v62 = vld [vmem:[#allocation7 + $0x68] sm:$0xff]  ;;  %v142_v63 = vld [vmem:[#allocation7 + $0x78] sm:$0xff] }
  0x75   :  { %403 = vmatprep.subr.mxu0 %v228_v17  ;;  %474 = vmatprep.subr.mxu1 %v230_v18  ;;  %v139_v1 = vld [vmem:[#allocation7 + $0x60] sm:$0xff]  ;;  %v141_v2 = vld [vmem:[#allocation7 + $0x70] sm:$0xff]  ;;  %v132_v3 = vld [vmem:[#allocation7 + $0x28] sm:$0xff] }
  0x76   :  { %404 = vmatpush1.msra.mxu0 %v227_v19  ;;  %475 = vmatpush1.msra.mxu1 %v229_v20  ;;  %v134_v5 = vld [vmem:[#allocation7 + $0x38] sm:$0xff]  ;;  %v131_v6 = vld [vmem:[#allocation7 + $0x20] sm:$0xff]  ;;  %v133_v8 = vld [vmem:[#allocation7 + $0x30] sm:$0xff]  ;;  %v1669_v19 = vmov 3  }
  0x77   :  { %405 = vmatprep.subr.mxu0 %v220_v21  ;;  %476 = vmatprep.subr.mxu1 %v222_v22  ;;  %v677_v7 = vld [vmem:[#allocation5] sm:$0xff]  ;;  %v701_v11 = vld [vmem:[%s2002_s5 + $0x78] sm:$0xff]  ;;  %v588_v12 = vld [vmem:[#allocation8] sm:$0xff]  ;;  %v1670_v21 = vmov 1  }
  0x78   :  { %406 = vmatpush1.msra.mxu0 %v219_v23  ;;  %477 = vmatpush1.msra.mxu1 %v221_v24  ;;  %v680_v10 = vmul.f32 2.0, %v677_v7  ;;  %v700_v14 = vld [vmem:[%s2002_s5 + $0x70] sm:$0xff]  ;;  %v699_v15 = vld [vmem:[%s2002_s5 + $0x68] sm:$0xff]  ;;  %v698_v16 = vld [vmem:[%s2002_s5 + $0x60] sm:$0xff] }
  0x79   :  { %407 = vmatprep.subr.mxu0 %v212_v25  ;;  %478 = vmatprep.subr.mxu1 %v214_v26  ;;  %v697_v17 = vld [vmem:[%s2002_s5 + $0x58] sm:$0xff]  ;;  %v696_v18 = vld [vmem:[%s2002_s5 + $0x50] sm:$0xff]  ;;  %v695_v20 = vld [vmem:[%s2002_s5 + $0x48] sm:$0xff]  ;;  %v116_v25 = vlaneseq  ;;  %v1671_v26 = vmov 4  }
  0x7a   :  { %408 = vmatpush1.msra.mxu0 %v211_v27  ;;  %479 = vmatpush1.msra.mxu1 %v213_v28  ;;  %1487 = vtanh.f32 %v680_v10  ;;  %v694_v22 = vld [vmem:[%s2002_s5 + $0x40] sm:$0xff]  ;;  %v693_v24 = vld [vmem:[%s2002_s5 + $0x38] sm:$0xff]  ;;  %v692_v27 = vld [vmem:[%s2002_s5 + $0x30] sm:$0xff] }
  0x7b   :  { %409 = vmatprep.subr.mxu0 %v204_v29  ;;  %480 = vmatprep.subr.mxu1 %v206_v30  ;;  %1489 = vtanh.f32 %v677_v7  ;;  %v1672_v29 = vmov 5   ;;  %v687_v41 = vld [vmem:[%s2002_s5 + $0x8] sm:$0xff] }
  0x7c   :  { %410 = vmatpush1.msra.mxu0 %v203_v31  ;;  %481 = vmatpush1.msra.mxu1 %v205_v32  ;;  %v1486_v9 = vpop.eup %1485  ;;  %v691_v31 = vld [vmem:[%s2002_s5 + $0x28] sm:$0xff]  ;;  %v1826_v32 = vand.u32 127, %v116_v25 }
  0x7d   :  { %411 = vmatprep.subr.mxu0 %v196_v33  ;;  %482 = vmatprep.subr.mxu1 %v198_v34  ;;  %v1770_v13 = vmul.f32 3.1415927, %v1486_v9  ;;  %v690_v33 = vld [vmem:[%s2002_s5 + $0x20] sm:$0xff]  ;;  %v1673_v34 = vmov 6  }
  0x7e   :  { %412 = vmatpush1.msra.mxu0 %v195_v35  ;;  %483 = vmatpush1.msra.mxu1 %v197_v36  ;;  %vm118_vm2 = vcmp.lt.s32.totalorder %v1826_v32, 64 }
  0x7f   :  { %413 = vmatprep.subr.mxu0 %v188_v37  ;;  %484 = vmatprep.subr.mxu1 %v190_v38  ;;  %v689_v37 = vld [vmem:[%s2002_s5 + $0x18] sm:$0xff]  ;;  %v1674_v38 = vmov 7  }
  0x80   :  { %414 = vmatpush1.msra.mxu0 %v187_v39  ;;  %485 = vmatpush1.msra.mxu1 %v189_v40  ;;  %v688_v39 = vld [vmem:[%s2002_s5 + $0x10] sm:$0xff] }
  0x81   :  { %415 = vmatprep.subr.mxu0 %v180_v42  ;;  %486 = vmatprep.subr.mxu1 %v182_v43  ;;  %v686_v42 = vld [vmem:[%s2002_s5] sm:$0xff] }
  0x82   :  { %416 = vmatpush1.msra.mxu0 %v179_v44  ;;  %487 = vmatpush1.msra.mxu1 %v181_v45  ;;  %v792_v44 = vld [vmem:[#allocation10 + $0x78] sm:$0xff]  ;;  %v791_v45 = vld [vmem:[#allocation10 + $0x70] sm:$0xff] }
  0x83   :  { %417 = vmatprep.subr.mxu0 %v172_v46  ;;  %488 = vmatprep.subr.mxu1 %v174_v47  ;;  %v790_v46 = vld [vmem:[#allocation10 + $0x68] sm:$0xff]  ;;  %v788_v47 = vld [vmem:[#allocation10 + $0x58] sm:$0xff] }
  0x84   :  { %418 = vmatpush1.msra.mxu0 %v171_v48  ;;  %489 = vmatpush1.msra.mxu1 %v173_v49  ;;  %v787_v48 = vld [vmem:[#allocation10 + $0x50] sm:$0xff]  ;;  %v786_v49 = vld [vmem:[#allocation10 + $0x48] sm:$0xff] }
  0x85   :  { %419 = vmatprep.subr.mxu0 %v164_v50  ;;  %490 = vmatprep.subr.mxu1 %v166_v51  ;;  %v785_v50 = vld [vmem:[#allocation10 + $0x40] sm:$0xff]  ;;  %v784_v51 = vld [vmem:[#allocation10 + $0x38] sm:$0xff] }
  0x86   :  { %420 = vmatpush1.msra.mxu0 %v163_v52  ;;  %491 = vmatpush1.msra.mxu1 %v165_v53  ;;  %v783_v52 = vld [vmem:[#allocation10 + $0x30] sm:$0xff]  ;;  %v782_v53 = vld [vmem:[#allocation10 + $0x28] sm:$0xff] }
  0x87   :  { %421 = vmatprep.subr.mxu0 %v156_v54  ;;  %492 = vmatprep.subr.mxu1 %v158_v55  ;;  %v1488_v23 = vpop.eup %1487  ;;  %v781_v54 = vld [vmem:[#allocation10 + $0x20] sm:$0xff]  ;;  %v780_v55 = vld [vmem:[#allocation10 + $0x18] sm:$0xff] }
  0x88   :  { %422 = vmatpush1.msra.mxu0 %v155_v56  ;;  %493 = vmatpush1.msra.mxu1 %v157_v57  ;;  %v682_v28 = vmul.f32 1.5707964, %v1488_v23  ;;  %v1490_v30 = vpop.eup %1489  ;;  %v779_v56 = vld [vmem:[#allocation10 + $0x10] sm:$0xff]  ;;  %v778_v57 = vld [vmem:[#allocation10 + $0x8] sm:$0xff] }
  0x89   :  { %423 = vmatprep.subr.mxu0 %v148_v58  ;;  %494 = vmatprep.subr.mxu1 %v150_v59  ;;  %v679_v35 = vmul.f32 3.1415927, %v1490_v30  ;;  %v777_v58 = vld [vmem:[#allocation10] sm:$0xff] }
  0x8a   :  { %424 = vmatpush1.msra.mxu0 %v147_v60  ;;  %495 = vmatpush1.msra.mxu1 %v149_v61  ;;  %v683_v36 = vadd.f32 1.5707964, %v682_v28 }
  0x8b   :  { %425 = vmatprep.subr.mxu0 %v140_v62  ;;  %496 = vmatprep.subr.mxu1 %v142_v63 }
  0x8c   :  { %426 = vmatpush1.msra.mxu0 %v139_v1  ;;  %497 = vmatpush1.msra.mxu1 %v141_v2  ;;  %v684_v40 = vsel %vm118_vm2, %v679_v35, %v683_v36 }
  0x8d   :  { %427 = vmatprep.subr.mxu0 %v132_v3  ;;  %498 = vmatprep.subr.mxu1 %v134_v5  ;;  %v685_v43 = vadd.f32 %v684_v40, %v1759_v4  ;;  %v881_v40 = vld [vmem:[#allocation11 + $0x68] sm:$0xff] }
  0x8e   :  { %428 = vmatpush1.msra.mxu0 %v131_v6  ;;  %461 = vmatprep.mubr.f32.mxu0 %v1665_v0 }
  0x8f   :  { %499 = vmatpush1.msra.mxu1 %v133_v8  ;;  %532 = vmatprep.mubr.f32.mxu1 %v1665_v0 }
  0x90   :  { %462 = vmatmul.mubr.f32.vlgmr.msra.gmra.mxu0 %v1759_v4  ;;  %533 = vmatmul.mubr.f32.vlgmr.msra.gmra.mxu1 %v1759_v4  ;;  %v789_v4 = vld [vmem:[#allocation10 + $0x60] sm:$0xff] }
  0x91   :  { %1296 = vmatprep.subr.mxu1 %v1665_v0  ;;  %1291 = vmatprep.subr.mxu0 %v1665_v0 }
  0x92   :  { %1297 = vmatpush3.msra.mxu1 %v701_v11  ;;  %1292 = vmatpush3.msra.mxu0 %v588_v12 }
  0x93   :  { %1298 = vmatprep.subr.mxu1 %v1665_v0  ;;  %1293 = vmatprep.mubr.msk.f32.mxu0 %vm1668_vm1, %v1665_v0 }
  0x94   :  { %1299 = vmatpush3.msra.mxu1 %v700_v14  ;;  %1294 = vmatmul.mubr.msk.f32.vlgmr.msra.gmra.mxu0 %vm589_vm0, %v1770_v13 }
  0x95   :  { %1300 = vmatprep.subr.mxu1 %v1665_v0  ;;  %1328 = vmatprep.mubr.msk.f32.mxu1 %vm1668_vm1, %v1665_v0 }
  0x96   :  { %1301 = vmatpush3.msra.mxu1 %v699_v15  ;;  %553 = vperm.xlu1 %1478, %v1770_v13  }
  0x97   :  { %1302 = vmatprep.subr.mxu1 %v1665_v0  ;;  %541 = vperm.xlu0 %1476, %v1770_v13  }
  0x98   :  { %1303 = vmatpush3.msra.mxu1 %v698_v16  ;;  %1331 = vmatprep.subr.mxu0 %v1665_v0 }
  0x99   :  { %1304 = vmatprep.subr.mxu1 %v1665_v0  ;;  %1363 = vmatprep.mubr.msk.f32.mxu0 %vm1668_vm1, %v1665_v0 }
  0x9a   :  { %1305 = vmatpush3.msra.mxu1 %v697_v17  ;;  %1479 = vset.pattern.permute.xlu1 %v1669_v19 }
  0x9b   :  { %1306 = vmatprep.subr.mxu1 %v1665_v0  ;;  %1477 = vset.pattern.permute.xlu0 %v1670_v21 }
  0x9c   :  { %1307 = vmatpush3.msra.mxu1 %v696_v18  ;;  %559 = vperm.xlu1 %1479, %v1770_v13  }
  0x9d   :  { %1308 = vmatprep.subr.mxu1 %v1665_v0  ;;  %547 = vperm.xlu0 %1477, %v1770_v13  }
  0x9e   :  { %1309 = vmatpush3.msra.mxu1 %v695_v20  ;;  %1332 = vmatpush3.msra.mxu0 %v792_v44  ;;  %v877_v44 = vld [vmem:[#allocation11 + $0x48] sm:$0xff] }
  0x9f   :  { %1310 = vmatprep.subr.mxu1 %v1665_v0  ;;  %1333 = vmatprep.subr.mxu0 %v1665_v0 }
  0xa0   :  { %1311 = vmatpush3.msra.mxu1 %v694_v22  ;;  %1480 = vset.pattern.permute.xlu1 %v1671_v26 }
  0xa1   :  { %1312 = vmatprep.subr.mxu1 %v1665_v0  ;;  %565 = vperm.xlu1 %1480, %v1770_v13  }
  0xa2   :  { %1313 = vmatpush3.msra.mxu1 %v693_v24  ;;  %1481 = vset.pattern.permute.xlu0 %v1672_v29 }
  0xa3   :  { %1314 = vmatprep.subr.mxu1 %v1665_v0  ;;  %571 = vperm.xlu0 %1481, %v1770_v13  }
  0xa4   :  { %1315 = vmatpush3.msra.mxu1 %v692_v27  ;;  %1334 = vmatpush3.msra.mxu0 %v791_v45  ;;  %v876_v45 = vld [vmem:[#allocation11 + $0x40] sm:$0xff] }
  0xa5   :  { %1316 = vmatprep.subr.mxu1 %v1665_v0  ;;  %1482 = vset.pattern.permute.xlu1 %v1673_v34 }
  0xa6   :  { %1317 = vmatpush3.msra.mxu1 %v691_v31  ;;  %577 = vperm.xlu1 %1482, %v1770_v13  }
  0xa7   :  { %1318 = vmatprep.subr.mxu1 %v1665_v0  ;;  %1484 = vset.pattern.permute.xlu0 %v1674_v38 }
  0xa8   :  { %1319 = vmatpush3.msra.mxu1 %v690_v33  ;;  %1335 = vmatprep.subr.mxu0 %v1665_v0  ;;  %v1203_v33 = vld [vmem:[%s2007_s10] ss:$0 sm:$0xff] }
  0xa9   :  { %1320 = vmatprep.subr.mxu1 %v1665_v0  ;;  %1336 = vmatpush3.msra.mxu0 %v790_v46  ;;  %v875_v46 = vld [vmem:[#allocation11 + $0x38] sm:$0xff] }
  0xaa   :  { %1321 = vmatpush3.msra.mxu1 %v689_v37  ;;  %1483 = vset.pattern.permute.xlu1 %v1674_v38  ;;  %v883_v38 = vld [vmem:[#allocation11 + $0x78] sm:$0xff] }
  0xab   :  { %1322 = vmatprep.subr.mxu1 %v1665_v0  ;;  %583 = vperm.xlu1 %1483, %v1770_v13  }
  0xac   :  { %1323 = vmatpush3.msra.mxu1 %v688_v39  ;;  %1337 = vmatprep.subr.mxu0 %v1665_v0  ;;  %v882_v39 = vld [vmem:[#allocation11 + $0x70] sm:$0xff] }
  0xad   :  { %1324 = vmatprep.subr.mxu1 %v1665_v0  ;;  %1338 = vmatpush3.msra.mxu0 %v789_v4  ;;  %v874_v4 = vld [vmem:[#allocation11 + $0x30] sm:$0xff] }
  0xae   :  { %1325 = vmatpush3.msra.mxu1 %v687_v41  ;;  %1339 = vmatprep.subr.mxu0 %v1665_v0  ;;  %v880_v41 = vld [vmem:[#allocation11 + $0x60] sm:$0xff] }
  0xaf   :  { %1326 = vmatprep.subr.mxu1 %v1665_v0  ;;  %1340 = vmatpush3.msra.mxu0 %v788_v47  ;;  %v873_v47 = vld [vmem:[#allocation11 + $0x28] sm:$0xff] }
  0xb0   :  { %1327 = vmatpush3.msra.mxu1 %v686_v42  ;;  %1341 = vmatprep.subr.mxu0 %v1665_v0  ;;  %v879_v42 = vld [vmem:[#allocation11 + $0x58] sm:$0xff] }
  0xb1   :  { %1329 = vmatmul.mubr.f32.vlgmr.msra.gmra.mxu1 %v685_v43  ;;  %1366 = vmatprep.subr.mxu1 %v1665_v0  ;;  %v878_v43 = vld [vmem:[#allocation11 + $0x50] sm:$0xff] }
  0xb2   :  { %1398 = vmatprep.mubr.msk.f32.mxu1 %vm1668_vm1, %v1665_v0  ;;  %1342 = vmatpush3.msra.mxu0 %v787_v48  ;;  %v872_v48 = vld [vmem:[#allocation11 + $0x20] sm:$0xff] }
  0xb3   :  { %1343 = vmatprep.subr.mxu0 %v1665_v0  ;;  %1367 = vmatpush3.msra.mxu1 %v883_v38 }
  0xb4   :  { %1344 = vmatpush3.msra.mxu0 %v786_v49  ;;  %1368 = vmatprep.subr.mxu1 %v1665_v0  ;;  %v871_v49 = vld [vmem:[#allocation11 + $0x18] sm:$0xff] }
  0xb5   :  { %1345 = vmatprep.subr.mxu0 %v1665_v0  ;;  %1369 = vmatpush3.msra.mxu1 %v882_v39 }
  0xb6   :  { %1346 = vmatpush3.msra.mxu0 %v785_v50  ;;  %1370 = vmatprep.subr.mxu1 %v1665_v0  ;;  %v870_v50 = vld [vmem:[#allocation11 + $0x10] sm:$0xff] }
  0xb7   :  { %1347 = vmatprep.subr.mxu0 %v1665_v0  ;;  %1371 = vmatpush3.msra.mxu1 %v881_v40 }
  0xb8   :  { %1348 = vmatpush3.msra.mxu0 %v784_v51  ;;  %1372 = vmatprep.subr.mxu1 %v1665_v0  ;;  %v869_v51 = vld [vmem:[#allocation11 + $0x8] sm:$0xff] }
  0xb9   :  { %1349 = vmatprep.subr.mxu0 %v1665_v0  ;;  %1373 = vmatpush3.msra.mxu1 %v880_v41  ;;  %v1071_v41 = vld [vmem:[%s2006_s9 + $0x18] sm:$0xff] }
  0xba   :  { %1350 = vmatpush3.msra.mxu0 %v783_v52  ;;  %1374 = vmatprep.subr.mxu1 %v1665_v0  ;;  %v868_v52 = vld [vmem:[#allocation11] sm:$0xff] }
  0xbb   :  { %1351 = vmatprep.subr.mxu0 %v1665_v0  ;;  %1375 = vmatpush3.msra.mxu1 %v879_v42  ;;  %v1070_v42 = vld [vmem:[%s2006_s9 + $0x10] sm:$0xff] }
  0xbc   :  { %1352 = vmatpush3.msra.mxu0 %v782_v53  ;;  %1376 = vmatprep.subr.mxu1 %v1665_v0 }
  0xbd   :  { %1353 = vmatprep.subr.mxu0 %v1665_v0  ;;  %1377 = vmatpush3.msra.mxu1 %v878_v43  ;;  %v1069_v43 = vld [vmem:[%s2006_s9 + $0x8] sm:$0xff] }
  0xbe   :  { %1354 = vmatpush3.msra.mxu0 %v781_v54  ;;  %1378 = vmatprep.subr.mxu1 %v1665_v0 }
  0xbf   :  { %1355 = vmatprep.subr.mxu0 %v1665_v0  ;;  %1379 = vmatpush3.msra.mxu1 %v877_v44  ;;  %v1068_v44 = vld [vmem:[%s2006_s9] sm:$0xff] }
  0xc0   :  { %1356 = vmatpush3.msra.mxu0 %v780_v55  ;;  %1380 = vmatprep.subr.mxu1 %v1665_v0 }
  0xc1   :  { %1357 = vmatprep.subr.mxu0 %v1665_v0  ;;  %1381 = vmatpush3.msra.mxu1 %v876_v45  ;;  %v1206_v45 = vld [vmem:[%s2007_s10 + $0x3] ss:$0 sm:$0xff] }
  0xc2   :  { %1358 = vmatpush3.msra.mxu0 %v779_v56  ;;  %1382 = vmatprep.subr.mxu1 %v1665_v0 }
  0xc3   :  { %1359 = vmatprep.subr.mxu0 %v1665_v0  ;;  %1383 = vmatpush3.msra.mxu1 %v875_v46 }
  0xc4   :  { %1360 = vmatpush3.msra.mxu0 %v778_v57  ;;  %1384 = vmatprep.subr.mxu1 %v1665_v0 }
  0xc5   :  { %1361 = vmatprep.subr.mxu0 %v1665_v0  ;;  %1385 = vmatpush3.msra.mxu1 %v874_v4 }
  0xc6   :  { %1362 = vmatpush3.msra.mxu0 %v777_v58  ;;  %1386 = vmatprep.subr.mxu1 %v1665_v0 }
  0xc7   :  { %1387 = vmatpush3.msra.mxu1 %v873_v47 }
  0xc8   :  { %1388 = vmatprep.subr.mxu1 %v1665_v0 }
  0xc9   :  { %1389 = vmatpush3.msra.mxu1 %v872_v48 }
  0xca   :  { %1390 = vmatprep.subr.mxu1 %v1665_v0 }
  0xcb   :  { %1391 = vmatpush3.msra.mxu1 %v871_v49 }
  0xcc   :  { %1392 = vmatprep.subr.mxu1 %v1665_v0 }
  0xcd   :  { %1393 = vmatpush3.msra.mxu1 %v870_v50 }
  0xce   :  { %1394 = vmatprep.subr.mxu1 %v1665_v0 }
  0xcf   :  { %1395 = vmatpush3.msra.mxu1 %v869_v51 }
  0xd0   :  { %1396 = vmatprep.subr.mxu1 %v1665_v0  ;;  %v1204_v0 = vld [vmem:[%s2007_s10 + $0x1] ss:$0 sm:$0xff] }
  0xd1   :  { %1397 = vmatpush3.msra.mxu1 %v868_v52  ;;  %v1207_v52 = vld [vmem:[%s2007_s10 + $0x4] ss:$0 sm:$0xff] }
 0x111   :  { %v554_v60 = vpop.permute.xlu1 %553 }
 0x112   :  { %v542_v59 = vpop.permute.xlu0 %541 }
 0x117   :  { %v560_v1 = vpop.permute.xlu1 %559 }
 0x118   :  { %v548_v62 = vpop.permute.xlu0 %547 }
 0x11c   :  { %v566_v5 = vpop.permute.xlu1 %565 }
 0x11e   :  { %v572_v13 = vpop.permute.xlu0 %571 }
 0x121   :  { %v578_v11 = vpop.permute.xlu1 %577 }
 0x126   :  { %v584_v20 = vpop.permute.xlu1 %583 }
 0x12e   :  { %v321_v61 = vpop.f32.mrf.mxu0  ;;  %v392_v6 = vpop.f32.mrf.mxu1 }
 0x12f   :  { %v544_v2 = vmul.f32 %v542_v59, %v321_v61  ;;  %v556_v8 = vmul.f32 %v554_v60, %v392_v6  ;;  %v985_v6 = vld [vmem:[%s2005_s8 + $0x70] sm:$0xff] }
 0x130   :  { %v323_v63 = vpop.f32.mrf.mxu0  ;;  %v394_v9 = vpop.f32.mrf.mxu1 }
 0x131   :  { %v550_v3 = vmul.f32 %v548_v62, %v323_v63  ;;  %v562_v12 = vmul.f32 %v560_v1, %v394_v9  ;;  %v1205_v9 = vld [vmem:[%s2007_s10 + $0x2] ss:$0 sm:$0xff] }
 0x133   :  { %v551_v7 = vadd.f32 %v550_v3, %v544_v2 }
 0x135   :  { %v557_v10 = vadd.f32 %v556_v8, %v551_v7  ;;  %v984_v7 = vld [vmem:[%s2005_s8 + $0x68] sm:$0xff]  ;;  %v983_v8 = vld [vmem:[%s2005_s8 + $0x60] sm:$0xff] }
 0x137   :  { %v563_v16 = vadd.f32 %v562_v12, %v557_v10 }
 0x150   :  { %v463_v14 = vpop.f32.mrf.mxu0  ;;  %v534_v15 = vpop.f32.mrf.mxu1 }
 0x151   :  { %v568_v17 = vmul.f32 %v566_v5, %v463_v14  ;;  %v580_v24 = vmul.f32 %v578_v11, %v534_v15  ;;  %v986_v5 = vld [vmem:[%s2005_s8 + $0x78] sm:$0xff]  ;;  %v981_v15 = vld [vmem:[%s2005_s8 + $0x50] sm:$0xff] }
 0x152   :  { %v465_v18 = vpop.f32.mrf.mxu0  ;;  %v536_v22 = vpop.f32.mrf.mxu1  ;;  %1401 = vmatprep.subr.mxu0 %v986_v5  ;;  %v982_v14 = vld [vmem:[%s2005_s8 + $0x58] sm:$0xff] }
 0x153   :  { %v569_v19 = vadd.f32 %v568_v17, %v563_v16  ;;  %v574_v21 = vmul.f32 %v572_v13, %v465_v18  ;;  %v586_v27 = vmul.f32 %v584_v20, %v536_v22  ;;  %v980_v16 = vld [vmem:[%s2005_s8 + $0x48] sm:$0xff]  ;;  %v979_v17 = vld [vmem:[%s2005_s8 + $0x40] sm:$0xff]  ;;  %v978_v18 = vld [vmem:[%s2005_s8 + $0x38] sm:$0xff] }
 0x154   :  { %v658_v23 = vpop.f32.mrf.mxu0  ;;  %v976_v20 = vld [vmem:[%s2005_s8 + $0x28] sm:$0xff]  ;;  %v974_v22 = vld [vmem:[%s2005_s8 + $0x18] sm:$0xff] }
 0x155   :  { %v575_v25 = vadd.f32 %v574_v21, %v569_v19  ;;  %v977_v19 = vld [vmem:[%s2005_s8 + $0x30] sm:$0xff]  ;;  %v975_v21 = vld [vmem:[%s2005_s8 + $0x20] sm:$0xff] }
 0x156   :  { %v1295_v26 = vpop.f32.mrf.mxu0 }
 0x157   :  { %v581_v28 = vadd.f32 %v580_v24, %v575_v25  ;;  %v972_v24 = vld [vmem:[%s2005_s8 + $0x8] sm:$0xff]  ;;  %v971_v25 = vld [vmem:[%s2005_s8] sm:$0xff]  ;;  %v1075_v26 = vld [vmem:[%s2006_s9 + $0x38] sm:$0xff] }
 0x158   :  { %1436 = vmatprep.subr.mxu1 %v1075_v26 }
 0x159   :  { %v587_v29 = vadd.f32 %v586_v27, %v581_v28  ;;  %v1074_v27 = vld [vmem:[%s2006_s9 + $0x30] sm:$0xff]  ;;  %v1073_v28 = vld [vmem:[%s2006_s9 + $0x28] sm:$0xff] }
 0x15b   :  { %v1874_v30 = vadd.f32 %v658_v23, %v587_v29  ;;  %v973_v23 = vld [vmem:[%s2005_s8 + $0x10] sm:$0xff]  ;;  %v1072_v29 = vld [vmem:[%s2006_s9 + $0x20] sm:$0xff]  ;;  %s1675_s9 = smov [#allocation13]  }
 0x15c   :  { %s1190_s10 = sshll.u32 %s1675_s9, 4  ;;  %s1191_s10 = int_to_ptr.vmem [resolvable:$true] %s1190_s10 }
 0x15d   :  { %663 = vadd.xlane.f32.xlu0 %v1874_v30  ;;  %v667_v31 = vmul.f32 %v1874_v30, %v1874_v30  ;;  %s1625_s4 = scalar_lea.vmem %s1191_s10, 128  ;;  %p1630_p3 = scmp.lt.s32.totalorder %s1191_s10, %s1191_s10 }
 0x15e   :  { %p1626_p2 = scmp.ne.s32.totalorder %s1191_s10, %s1625_s4  ;;  %p1631_p4 = scmp.lt.s32.totalorder %s1625_s4, %s1625_s4 }
 0x160   :  { %p1632_p5 = por %p1631_p4, %p1630_p3 }
 0x161   :  { %668 = vadd.xlane.f32.xlu0 %v667_v31 }
 0x162   :  { %p1633_p6 = pnand %p1632_p5, %p1626_p2 }
 0x171   :  { %v772_v34 = vpop.f32.mrf.mxu1 }
 0x172   :  { %v773_v35 = vadd.f32 %v1203_v33, %v772_v34 }
 0x173   :  { %v1330_v36 = vpop.f32.mrf.mxu1 }
 0x174   :  { %v776_v37 = vmax.f32 %v773_v35, 0.0 }
 0x176   :  { %1364 = vmatmul.mubr.f32.vlgmr.msra.gmra.mxu0 %v776_v37 }
 0x177   :  { %1402 = vmatpush3.msra.mxu0 %v986_v5 }
 0x178   :  { %1403 = vmatprep.subr.mxu0 %v985_v6 }
 0x179   :  { %1404 = vmatpush3.msra.mxu0 %v985_v6 }
 0x17a   :  { %1405 = vmatprep.subr.mxu0 %v984_v7 }
 0x17b   :  { %1406 = vmatpush3.msra.mxu0 %v984_v7 }
 0x17c   :  { %1407 = vmatprep.subr.mxu0 %v983_v8 }
 0x17d   :  { %1408 = vmatpush3.msra.mxu0 %v983_v8 }
 0x17e   :  { %1409 = vmatprep.subr.mxu0 %v982_v14 }
 0x17f   :  { %1410 = vmatpush3.msra.mxu0 %v982_v14 }
 0x180   :  { %1411 = vmatprep.subr.mxu0 %v981_v15 }
 0x181   :  { %1412 = vmatpush3.msra.mxu0 %v981_v15 }
 0x182   :  { %1413 = vmatprep.subr.mxu0 %v980_v16 }
 0x183   :  { %1414 = vmatpush3.msra.mxu0 %v980_v16 }
 0x184   :  { %1415 = vmatprep.subr.mxu0 %v979_v17 }
 0x185   :  { %1416 = vmatpush3.msra.mxu0 %v979_v17 }
 0x186   :  { %1417 = vmatprep.subr.mxu0 %v978_v18 }
 0x187   :  { %1418 = vmatpush3.msra.mxu0 %v978_v18 }
 0x188   :  { %1419 = vmatprep.subr.mxu0 %v977_v19 }
 0x189   :  { %1420 = vmatpush3.msra.mxu0 %v977_v19 }
 0x18a   :  { %1421 = vmatprep.subr.mxu0 %v976_v20 }
 0x18b   :  { %1422 = vmatpush3.msra.mxu0 %v976_v20 }
 0x18c   :  { %1423 = vmatprep.subr.mxu0 %v975_v21 }
 0x18d   :  { %1424 = vmatpush3.msra.mxu0 %v975_v21 }
 0x18e   :  { %1425 = vmatprep.subr.mxu0 %v974_v22 }
 0x18f   :  { %1426 = vmatpush3.msra.mxu0 %v974_v22 }
 0x190   :  { %1427 = vmatprep.subr.mxu0 %v973_v23 }
 0x191   :  { %1428 = vmatpush3.msra.mxu0 %v973_v23 }
 0x192   :  { %1429 = vmatprep.subr.mxu0 %v972_v24 }
 0x193   :  { %1430 = vmatpush3.msra.mxu0 %v972_v24 }
 0x194   :  { %1431 = vmatprep.subr.mxu0 %v971_v25 }
 0x195   :  { %1432 = vmatpush3.msra.mxu0 %v971_v25 }
 0x1e6   :  { %v664_v53 = vpop.xlane.xlu0 %663 }
 0x1e7   :  { %v666_v54 = vmul.f32 0.0078125, %v664_v53 }
 0x1e9   :  { %v671_v56 = vmul.f32 %v666_v54, %v666_v54  ;;  %v673_v60 = vsub.f32 %v1874_v30, %v666_v54 }
 0x1ea   :  { %v669_v55 = vpop.xlane.xlu0 %668 }
 0x1eb   :  { %v670_v57 = vmul.f32 0.0078125, %v669_v55 }
 0x1ed   :  { %v672_v58 = vsub.f32 %v670_v57, %v671_v56 }
 0x1ef   :  { %v674_v59 = vadd.f32 1e-05, %v672_v58 }
 0x1f1   :  { %1491 = vrsqrt.f32 %v674_v59 }
 0x1fe   :  { %v1492_v61 = vpop.eup %1491 }
 0x1ff   :  { %v1898_v62 = vmul.f32 %v1492_v61, %v673_v60 }
 0x201   :  { %1433 = vmatprep.mubr.f32.mxu0 %v1898_v62 }
 0x236   :  { %v863_v63 = vpop.f32.mrf.mxu0 }
 0x237   :  { %v864_v1 = vadd.f32 %v1204_v0, %v863_v63 }
 0x238   :  { %v1365_v2 = vpop.f32.mrf.mxu0 }
 0x239   :  { %v867_v3 = vmax.f32 %v864_v1, 0.0 }
 0x23b   :  { %1399 = vmatmul.mubr.f32.vlgmr.msra.gmra.mxu1 %v867_v3 }
 0x23c   :  { %1437 = vmatpush3.msra.mxu1 %v1075_v26 }
 0x23d   :  { %1438 = vmatprep.subr.mxu1 %v1074_v27 }
 0x23e   :  { %1439 = vmatpush3.msra.mxu1 %v1074_v27 }
 0x23f   :  { %1440 = vmatprep.subr.mxu1 %v1073_v28 }
 0x240   :  { %1441 = vmatpush3.msra.mxu1 %v1073_v28 }
 0x241   :  { %1442 = vmatprep.subr.mxu1 %v1072_v29 }
 0x242   :  { %1443 = vmatpush3.msra.mxu1 %v1072_v29 }
 0x243   :  { %1444 = vmatprep.subr.mxu1 %v1071_v41 }
 0x244   :  { %1445 = vmatpush3.msra.mxu1 %v1071_v41 }
 0x245   :  { %1446 = vmatprep.subr.mxu1 %v1070_v42 }
 0x246   :  { %1447 = vmatpush3.msra.mxu1 %v1070_v42 }
 0x247   :  { %1448 = vmatprep.subr.mxu1 %v1069_v43 }
 0x248   :  { %1449 = vmatpush3.msra.mxu1 %v1069_v43 }
 0x249   :  { %1450 = vmatprep.subr.mxu1 %v1068_v44 }
 0x24a   :  { %1451 = vmatpush3.msra.mxu1 %v1068_v44 }
 0x2fb   :  { %v954_v10 = vpop.f32.mrf.mxu1 }
 0x2fc   :  { %v1919_v11 = vadd.f32 %v1205_v9, %v954_v10 }
 0x2fd   :  { %v1400_v12 = vpop.f32.mrf.mxu1 }
 0x2fe   :  { %958 = vadd.xlane.f32.xlu1 %v1919_v11  ;;  %v961_v13 = vmul.f32 %v1919_v11, %v1919_v11 }
 0x300   :  { %962 = vadd.xlane.f32.xlu0 %v961_v13 }
 0x387   :  { %v959_v30 = vpop.xlane.xlu1 %958 }
 0x388   :  { %v960_v31 = vmul.f32 0.0078125, %v959_v30 }
 0x389   :  { %v963_v33 = vpop.xlane.xlu0 %962 }
 0x38a   :  { %v965_v34 = vmul.f32 %v960_v31, %v960_v31  ;;  %v964_v35 = vmul.f32 0.0078125, %v963_v33  ;;  %v967_v38 = vsub.f32 %v1919_v11, %v960_v31 }
 0x38c   :  { %v966_v36 = vsub.f32 %v964_v35, %v965_v34 }
 0x38e   :  { %v968_v37 = vadd.f32 1e-05, %v966_v36 }
 0x390   :  { %1493 = vrsqrt.f32 %v968_v37 }
 0x39d   :  { %v1494_v39 = vpop.eup %1493 }
 0x39e   :  { %v970_v40 = vmul.f32 %v1494_v39, %v967_v38 }
 0x3a0   :  { %1434 = vmatmul.mubr.f32.vlgmr.msra.gmra.mxu0 %v970_v40 }
 0x460   :  { %v1435_v46 = vpop.f32.mrf.mxu0 }
 0x461   :  { %v1063_v4 = vadd.f32 %v1435_v46, %v1206_v45 }
 0x462   :  { %v1057_v47 = vpop.f32.mrf.mxu0 }
 0x463   :  { %v1058_v48 = vadd.f32 %v1206_v45, %v1057_v47  ;;  %v1067_v50 = vmax.f32 %v1063_v4, 0.0 }
 0x465   :  { %v1066_v49 = vmax.f32 %v1058_v48, 0.0 }
 0x467   :  { %1452 = vmatprep.mubr.msk.f32.mxu1 %vm1080_vm3, %v1066_v49 }
 0x468   :  { %1453 = vmatmul.mubr.msk.f32.vlgmr.msra.gmra.mxu1 %vm1080_vm3, %v1067_v50 }
 0x528   :  { %v1454_v51 = vpop.f32.mrf.mxu1 }
 0x529   :  { %v1159_v54 = vadd.f32 %v1454_v51, %v1207_v52 }
 0x52a   :  { %v1153_v53 = vpop.f32.mrf.mxu1 }
 0x52b   :  { %v1154_v55 = vadd.f32 %v1207_v52, %v1153_v53 }
 0x52d   :  { %v1162_v56 = vmax.f32 %v1154_v55, %v1159_v54 }
 0x52f   :  { %v1163_v57 = vsub.f32 %v1154_v55, %v1162_v56  ;;  %v1166_v58 = vsub.f32 %v1159_v54, %v1162_v56 }
 0x531   :  { %v1164_v59 = vmul.f32 1.442695, %v1163_v57  ;;  %v1167_v60 = vmul.f32 1.442695, %v1166_v58 }
 0x533   :  { %1495 = vpow2.f32 %v1164_v59 }
 0x534   :  { %1497 = vpow2.f32 %v1167_v60 }
 0x540   :  { %v1496_v61 = vpop.eup %1495 }
 0x541   :  { %v1498_v0 = vpop.eup %1497 }
 0x542   :  { %v1169_v63 = vadd.f32 %v1498_v0, %v1496_v61 }
 0x544   :  { %1499 = vrcp.f32 %v1169_v63 }
 0x551   :  { %v1500_v1 = vpop.eup %1499 }
 0x552   :  { %v1171_v2 = vmul.f32 %v1500_v1, %v1496_v61  ;;  %v1173_v3 = vmul.f32 %v1500_v1, %v1498_v0 }
 0x554   :  { %v1172_v5 = vmul.f32 %v1171_v2, %v1898_v62  ;;  %v1174_v6 = vmul.f32 %v1173_v3, %v970_v40 }
 0x556   :  { %v1175_v7 = vadd.f32 %v1174_v6, %v1172_v5 }
 0x558   :  { %v1178_v8 = vmul.f32 2.0, %v1175_v7  ;;  %1501 = vtanh.f32 %v1175_v7 }
 0x55a   :  { %1503 = vtanh.f32 %v1178_v8 }
 0x565   :  { %v1502_v9 = vpop.eup %1501 }
 0x566   :  { %v1177_v12 = vmul.f32 3.1415927, %v1502_v9 }
 0x567   :  { %v1504_v10 = vpop.eup %1503 }
 0x568   :  { %v1180_v11 = vmul.f32 1.5707964, %v1504_v10 }
 0x56a   :  { %v1181_v13 = vadd.f32 1.5707964, %v1180_v11 }
 0x56c   :  { %v1182_v14 = vsel %vm118_vm2, %v1177_v12, %v1181_v13 }
 0x56d   :  { %1183 = vst [vmem:[#allocation13] sm:$0xff] %v1182_v14 }
 0x56e   :  { %1636 = shalt.err (!%p1633_p6)
}
 0x56f   :  { %1193 = dma.vmem_to_hbm [thread:$0]  %s1191_s10, 128, %s2008_s11, [#allocation4]  }
 0x570   :  { %1653 = dma.done.wait [#allocation4], 128  }
 0x571   :  { %1654 = vsyncadd [#allocation4], 4294967168 }
 0x572   :  { %1197 = vsyncpa [#allocation3], 1 }
 0x573   :  { %1198 = vsyncpa [#allocation6], 1 }
 0x574   :  { %1199 = vsyncpa [#allocation9], 1 }
 0x575   :  { %1200 = vsyncpa [#allocation12], 1 }
 0x576   :  { %1201 = vsyncpa [#allocation4], 1 }

</bundles_post_ra>
